<compile_context>
chip_gen: v7x
topology: tpu7x:2x2x1
jax: 0.10.0
libtpu: 0.0.40
codegen_flags: <defaults>
</compile_context>

<pallas_src>
import jax
import jax.numpy as jnp
from jax.experimental import pallas as pl
from jax.experimental.pallas import tpu as pltpu


# ---------------------------------------------------------------------------
# Kernel 1: fused LayerNorm + LSTM block.
#   x_ref    : (BB, TB, E)  raw embeddings (LayerNorm applied in-kernel, f32)
#   wx_ref   : (E, 4H)      w_ih.T  (bf16, resident across the grid)
#   wh_ref   : (H, 4H)      w_hh.T  (bf16, resident across the grid)
#   b_ref    : (1, 4H)      b_ih + b_hh (f32, resident)
#   hseq_ref : (BB, TB, H)  hidden-state sequence (bf16, one HBM writeback/blk)
#   h_scr/c_scr : (BB, H)   f32 recurrent state carried across time blocks
# Gate order matches PyTorch: [i, f, g, o].
# ---------------------------------------------------------------------------
def lstm_kernel(x_ref, wx_ref, wh_ref, b_ref, hseq_ref, h_scr, c_scr):
    tblk = pl.program_id(1)

    @pl.when(tblk == 0)
    def _():
        h_scr[...] = jnp.zeros_like(h_scr)
        c_scr[...] = jnp.zeros_like(c_scr)

    BB, TB, E = x_ref.shape
    H = h_scr.shape[-1]

    # Fused LayerNorm (elementwise_affine=False, eps=1e-5), f32, whole block.
    x = x_ref[...].astype(jnp.float32)
    mean = jnp.mean(x, axis=-1, keepdims=True)
    var = jnp.mean((x - mean) ** 2, axis=-1, keepdims=True)
    x = (x - mean) * jax.lax.rsqrt(var + 1e-5)

    # Hoisted input projection: one big MXU matmul (M = BB*TB) in bf16,
    # f32 accumulation.  Replaces TB tiny concat+matmul steps.
    wx = wx_ref[...]
    xw = jnp.dot(
        x.reshape(BB * TB, E).astype(wx.dtype), wx,
        preferred_element_type=jnp.float32,
    ).reshape(BB, TB, 4 * H)

    bias = jnp.broadcast_to(b_ref[...], (BB, 4 * H))   # broadcast hoisted
    wh = wh_ref[...]

    h = h_scr[...]
    c = c_scr[...]
    # TB is a small compile-time constant -> fully unrolled, all slices static.
    # NOTE(perf): if a bundle dump at large TB shows vreg spills, switch this
    # to lax.fori_loop(..., unroll=4..8) reading xw from a VMEM scratch.
    for tb in range(TB):
        gates = xw[:, tb, :] + bias + jnp.dot(
            h.astype(wh.dtype), wh, preferred_element_type=jnp.float32)
        # sigmoid(x) == 0.5*(tanh(0.5*x)+1): one EUP push per gate.
        # NOTE: with H a multiple of 128 these gate slices are whole lane
        # tiles; at the tiny demo H they are sub-lane selects (unavoidable).
        i = 0.5 * (jnp.tanh(0.5 * gates[:, 0 * H:1 * H]) + 1.0)
        f = 0.5 * (jnp.tanh(0.5 * gates[:, 1 * H:2 * H]) + 1.0)
        g = jnp.tanh(gates[:, 2 * H:3 * H])
        o = 0.5 * (jnp.tanh(0.5 * gates[:, 3 * H:4 * H]) + 1.0)
        c = f * c + i * g
        h = o * jnp.tanh(c)
        hseq_ref[:, tb, :] = h.astype(hseq_ref.dtype)   # bf16 store, once/blk

    h_scr[...] = h
    c_scr[...] = c


# ---------------------------------------------------------------------------
# Kernel 2: fused head, tiled over (row tiles, vocab tiles):
#   relu(h @ w_l.T + b_l) @ emb.T
# The ReLU output is computed only on the first vocab tile of each row tile
# (into VMEM scratch) and reused for all V//tv vocab tiles.  emb is passed
# un-transposed; the contraction on E is a trans_b matmul on the MXU.
# ---------------------------------------------------------------------------
def head_kernel(h_ref, wl_ref, bl_ref, emb_ref, o_ref, y_scr):
    @pl.when(pl.program_id(1) == 0)
    def _():
        y = jnp.dot(h_ref[...], wl_ref[...], preferred_element_type=jnp.float32)
        y = y + bl_ref[...]
        y_scr[...] = jnp.maximum(y, 0.0).astype(y_scr.dtype)

    o_ref[...] = jax.lax.dot_general(
        y_scr[...], emb_ref[...],
        dimension_numbers=(((1,), (1,)), ((), ())),   # contract on E == y @ emb.T
        preferred_element_type=jnp.float32,
    )


# ---------------------------------------------------------------------------
# Wrapper helpers
# ---------------------------------------------------------------------------
def _pick_time_block(T, cap):
    # divisor of T, <= cap, and either == T or a multiple of 8 (sublane dim).
    for d in range(min(T, cap), 0, -1):
        if T % d == 0 and (d == T or d % 8 == 0):
            return d
    return T


def _pick_batch_block(B):
    # >= 2 batch blocks when possible so v7x's second TensorCore gets work;
    # prefer multiples of 8.  Single-TC chips are unaffected.
    if B <= 1:
        return B
    cap = max(1, B // 2)
    best = None
    for d in range(cap, 0, -1):
        if B % d == 0:
            if d % 8 == 0:
                return d
            if best is None:
                best = d
    return best if best is not None else B


def _pick_tile(n, cap, align):
    # divisor of n, <= cap, and either == n or a multiple of `align`.
    for d in range(min(n, cap), 0, -1):
        if n % d == 0 and (d == n or d % align == 0):
            return d
    return n


def _vmem_limit_bytes():
    # Device-aware scoped-VMEM budget: ~75% of physical (=> ~96 MiB on
    # v5e/v6e's 128 MiB, ~48 MiB on v7x's 64 MiB), capped at 110 MiB.
    try:
        cap = pltpu.get_tpu_info().vmem_capacity_bytes
        return min(int(cap * 3 // 4), 110 * 1024 * 1024)
    except Exception:
        return 64 * 1024 * 1024


def _emb_block_spec(tv, E, n_vocab_tiles):
    index_map = lambda m, v: (v, 0)
    if n_vocab_tiles >= 4:
        # Deeper buffering on the only input that streams with the vocab axis.
        try:
            return pl.BlockSpec((tv, E), index_map, pipeline_mode=pl.Buffered(3))
        except Exception:
            pass
    return pl.BlockSpec((tv, E), index_map)


# ---------------------------------------------------------------------------
# Forward pass
# ---------------------------------------------------------------------------
def lstm_model_forward(tokens, params, *, time_block=32,
                       compute_dtype=jnp.bfloat16):
    emb = params["emb"]                       # (V, E) f32
    V, E = emb.shape
    H = params["w_hh"].shape[1]
    B, T = tokens.shape

    # Embedding lookup (gather) kept in plain JAX (glue).
    x = emb[tokens]                           # (B, T, E) f32, batch-first

    # bf16 matmul operands (f32 accumulation stays inside the kernels).
    w_x = params["w_ih"].T.astype(compute_dtype)                 # (E, 4H)
    w_h = params["w_hh"].T.astype(compute_dtype)                 # (H, 4H)
    b = (params["b_ih"] + params["b_hh"])[None, :].astype(jnp.float32)  # (1,4H)

    # NOTE(perf): for production sizes pick H, E as multiples of 128 so gate
    # slices / hseq stores are whole lane tiles.
    TB = _pick_time_block(T, time_block)      # timesteps per grid step
    BB = _pick_batch_block(B)                 # batch rows per grid step

    vmem_limit = _vmem_limit_bytes()

    h_seq = pl.pallas_call(
        lstm_kernel,
        out_shape=jax.ShapeDtypeStruct((B, T, H), compute_dtype),
        grid_spec=pltpu.PrefetchScalarGridSpec(
            num_scalar_prefetch=0,
            grid=(B // BB, T // TB),
            in_specs=[
                pl.BlockSpec((BB, TB, E), lambda bb, tt: (bb, tt, 0)),
                pl.BlockSpec((E, 4 * H), lambda bb, tt: (0, 0)),   # resident
                pl.BlockSpec((H, 4 * H), lambda bb, tt: (0, 0)),   # resident
                pl.BlockSpec((1, 4 * H), lambda bb, tt: (0, 0)),   # resident
            ],
            out_specs=pl.BlockSpec((BB, TB, H), lambda bb, tt: (bb, tt, 0)),
            scratch_shapes=[
                pltpu.VMEM((BB, H), jnp.float32),  # h state (f32)
                pltpu.VMEM((BB, H), jnp.float32),  # c state (f32)
            ],
        ),
        compiler_params=pltpu.CompilerParams(
            dimension_semantics=("parallel", "arbitrary"),
            vmem_limit_bytes=vmem_limit,
        ),
    )(x, w_x, w_h, b)

    # ---- fused Linear + ReLU + vocab-projection kernel -----------------
    BT = B * T
    h_flat = h_seq.reshape(BT, H)              # bf16, batch-first, no transpose
    tm = _pick_tile(BT, 512, 8)
    tv = _pick_tile(V, 2048, 128)

    w_l_t = params["w_l"].T.astype(compute_dtype)          # (H, E)
    b_l = params["b_l"][None, :].astype(jnp.float32)       # (1, E)
    emb_c = emb.astype(compute_dtype)                      # (V, E)

    logits = pl.pallas_call(
        head_kernel,
        out_shape=jax.ShapeDtypeStruct((BT, V), jnp.float32),
        grid_spec=pltpu.PrefetchScalarGridSpec(
            num_scalar_prefetch=0,
            grid=(BT // tm, V // tv),
            in_specs=[
                pl.BlockSpec((tm, H), lambda m, v: (m, 0)),    # resident over v
                pl.BlockSpec((H, E), lambda m, v: (0, 0)),     # resident
                pl.BlockSpec((1, E), lambda m, v: (0, 0)),     # resident
                _emb_block_spec(tv, E, V // tv),               # streams with v
            ],
            out_specs=pl.BlockSpec((tm, tv), lambda m, v: (m, v)),
            scratch_shapes=[pltpu.VMEM((tm, E), compute_dtype)],  # cached ReLU
        ),
        compiler_params=pltpu.CompilerParams(
            # vocab axis is 'arbitrary' (sequential) so the cached ReLU scratch
            # written at v == 0 is valid for all vocab tiles of the row tile.
            dimension_semantics=("parallel", "arbitrary"),
            vmem_limit_bytes=vmem_limit,
        ),
    )(h_flat, w_l_t, b_l, emb_c)

    return logits.reshape(B, T, V)


# ---------------------------------------------------------------------------
# Pure-JAX f32 reference (sanity check)
# ---------------------------------------------------------------------------
def reference_forward(tokens, p):
    x = p["emb"][tokens]
    mean = x.mean(-1, keepdims=True)
    var = ((x - mean) ** 2).mean(-1, keepdims=True)
    x = (x - mean) / jnp.sqrt(var + 1e-5)

    B = x.shape[0]
    H = p["w_hh"].shape[1]

    def step(carry, xt):
        h, c = carry
        gates = xt @ p["w_ih"].T + p["b_ih"] + h @ p["w_hh"].T + p["b_hh"]
        i, f, g, o = jnp.split(gates, 4, axis=-1)
        i = jax.nn.sigmoid(i)
        f = jax.nn.sigmoid(f)
        g = jnp.tanh(g)
        o = jax.nn.sigmoid(o)
        c = f * c + i * g
        h = o * jnp.tanh(c)
        return (h, c), h

    x_t = jnp.transpose(x, (1, 0, 2))
    (_, _), hs = jax.lax.scan(
        step, (jnp.zeros((B, H), jnp.float32), jnp.zeros((B, H), jnp.float32)), x_t
    )
    hs = jnp.transpose(hs, (1, 0, 2))
    y = jax.nn.relu(hs @ p["w_l"].T + p["b_l"])
    return y @ p["emb"].T


if __name__ == "__main__":
    # Small shapes implied by the module: vocab, embedding_dim, hidden_size
    V, E, H = 32, 16, 32            # input_size == embedding_dim for forward()
    B, T = 2, 8

    key = jax.random.PRNGKey(0)
    ks = jax.random.split(key, 8)
    s_ih = 1.0 / jnp.sqrt(E)
    s_h = 1.0 / jnp.sqrt(H)
    params = {
        "emb":  jax.random.normal(ks[0], (V, E), jnp.float32) * 0.1,
        "w_ih": jax.random.uniform(ks[1], (4 * H, E), jnp.float32, -s_ih, s_ih),
        "w_hh": jax.random.uniform(ks[2], (4 * H, H), jnp.float32, -s_h, s_h),
        "b_ih": jax.random.uniform(ks[3], (4 * H,), jnp.float32, -s_h, s_h),
        "b_hh": jax.random.uniform(ks[4], (4 * H,), jnp.float32, -s_h, s_h),
        "w_l":  jax.random.uniform(ks[5], (E, H), jnp.float32, -s_h, s_h),
        "b_l":  jax.random.uniform(ks[6], (E,), jnp.float32, -s_h, s_h),
    }
    tokens = jax.random.randint(ks[7], (B, T), 0, V, dtype=jnp.int32)

    out = lstm_model_forward(tokens, params)
    out = jax.block_until_ready(out)

    ref = jax.block_until_ready(reference_forward(tokens, params))
    assert out.shape == (B, T, V)
    # Tolerance loosened vs the f32 reference because matmul operands /
    # the hidden-sequence intermediate are bf16 (per perf review).
    assert jnp.allclose(out, ref, rtol=3e-2, atol=3e-2), "mismatch vs reference"

    print("KERNEL_OK")
</pallas_src>

<mosaic_0001>
module attributes {stable_mosaic.version = 11 : i64} {
  func.func @lstm_kernel(%arg0: i32, %arg1: i32, %arg2: memref<1x8x16xf32, #tpu.memory_space<vmem>>, %arg3: memref<16x128xbf16, #tpu.memory_space<vmem>>, %arg4: memref<32x128xbf16, #tpu.memory_space<vmem>>, %arg5: memref<1x128xf32, #tpu.memory_space<vmem>>, %arg6: memref<1x8x32xbf16, #tpu.memory_space<vmem>>, %arg7: memref<1x32xf32, #tpu.memory_space<vmem>>, %arg8: memref<1x32xf32, #tpu.memory_space<vmem>>) attributes {dimension_semantics = [#tpu.dimension_semantics<parallel>, #tpu.dimension_semantics<arbitrary>], iteration_bounds = array<i64: 2, 1>, scalar_prefetch = 0 : i64, scratch_operands = 2 : i64, tpu.core_type = #tpu.core_type<tc>, window_params = [{transform_indices = @transform_0, window_bounds = array<i64: 1, 8, 16>}, {pipeline_mode = #tpu.pipeline_mode<synchronous>, transform_indices = @transform_1, window_bounds = array<i64: 16, 128>}, {pipeline_mode = #tpu.pipeline_mode<synchronous>, transform_indices = @transform_2, window_bounds = array<i64: 32, 128>}, {pipeline_mode = #tpu.pipeline_mode<synchronous>, transform_indices = @transform_3, window_bounds = array<i64: 1, 128>}, {transform_indices = @transform_4, window_bounds = array<i64: 1, 8, 32>}]} {
    %c0_i32 = arith.constant 0 : i32
    %0 = arith.cmpi eq, %arg1, %c0_i32 : i32
    %1 = arith.extui %0 : i1 to i32
    %c0_i32_0 = arith.constant 0 : i32
    %2 = arith.cmpi ne, %1, %c0_i32_0 : i32
    scf.if %2 {
      %cst_119 = arith.constant 0.000000e+00 : f32
      %361 = vector.broadcast %cst_119 : f32 to vector<1x32xf32>
      %c0_120 = arith.constant 0 : index
      %c0_121 = arith.constant 0 : index
      %362 = vector.load %arg7[%c0_120, %c0_121] : memref<1x32xf32, #tpu.memory_space<vmem>>, vector<1x32xf32>
      tpu.vector_store %arg7[%c0_120, %c0_121], %361 {strides = array<i32>} : memref<1x32xf32, #tpu.memory_space<vmem>>, vector<1x32xf32>,
      %cst_122 = arith.constant 0.000000e+00 : f32
      %363 = vector.broadcast %cst_122 : f32 to vector<1x32xf32>
      %c0_123 = arith.constant 0 : index
      %c0_124 = arith.constant 0 : index
      %364 = vector.load %arg8[%c0_123, %c0_124] : memref<1x32xf32, #tpu.memory_space<vmem>>, vector<1x32xf32>
      tpu.vector_store %arg8[%c0_123, %c0_124], %363 {strides = array<i32>} : memref<1x32xf32, #tpu.memory_space<vmem>>, vector<1x32xf32>,
    } else {
    }
    %c0 = arith.constant 0 : index
    %c0_1 = arith.constant 0 : index
    %c0_2 = arith.constant 0 : index
    %3 = vector.load %arg2[%c0, %c0_1, %c0_2] : memref<1x8x16xf32, #tpu.memory_space<vmem>>, vector<1x8x16xf32>
    %cst = arith.constant dense<0.000000e+00> : vector<1x8xf32>
    %4 = vector.multi_reduction <add>, %3, %cst [2] : vector<1x8x16xf32> to vector<1x8xf32>
    %5 = vector.shape_cast %4 : vector<1x8xf32> to vector<1x8x1xf32>
    %cst_3 = arith.constant 1.600000e+01 : f32
    %6 = vector.broadcast %cst_3 : f32 to vector<1x8x1xf32>
    %7 = arith.divf %5, %6 : vector<1x8x1xf32>
    %8 = vector.broadcast %7 : vector<1x8x1xf32> to vector<1x8x16xf32>
    %9 = arith.subf %3, %8 : vector<1x8x16xf32>
    %10 = arith.mulf %9, %9 : vector<1x8x16xf32>
    %cst_4 = arith.constant dense<0.000000e+00> : vector<1x8xf32>
    %11 = vector.multi_reduction <add>, %10, %cst_4 [2] : vector<1x8x16xf32> to vector<1x8xf32>
    %12 = vector.shape_cast %11 : vector<1x8xf32> to vector<1x8x1xf32>
    %cst_5 = arith.constant 1.600000e+01 : f32
    %13 = vector.broadcast %cst_5 : f32 to vector<1x8x1xf32>
    %14 = arith.divf %12, %13 : vector<1x8x1xf32>
    %15 = vector.broadcast %7 : vector<1x8x1xf32> to vector<1x8x16xf32>
    %16 = arith.subf %3, %15 : vector<1x8x16xf32>
    %cst_6 = arith.constant 9.99999974E-6 : f32
    %17 = vector.broadcast %cst_6 : f32 to vector<1x8x1xf32>
    %18 = arith.addf %14, %17 : vector<1x8x1xf32>
    %19 = math.rsqrt %18 : vector<1x8x1xf32>
    %20 = vector.broadcast %19 : vector<1x8x1xf32> to vector<1x8x16xf32>
    %21 = arith.mulf %16, %20 : vector<1x8x16xf32>
    %c0_7 = arith.constant 0 : index
    %c0_8 = arith.constant 0 : index
    %22 = vector.load %arg3[%c0_7, %c0_8] : memref<16x128xbf16, #tpu.memory_space<vmem>>, vector<16x128xbf16>
    %23 = vector.shape_cast %21 : vector<1x8x16xf32> to vector<8x16xf32>
    %24 = arith.truncf %23 : vector<8x16xf32> to vector<8x16xbf16>
    %cst_9 = arith.constant dense<0.000000e+00> : vector<8x128xf32>
    %25 = tpu.matmul %24, %22, %cst_9 {dimension_numbers = #tpu.dot_dimension_numbers<[1], [0], [0], [1], [0, 0, 1, 1], [], []>} : vector<8x16xbf16>, vector<16x128xbf16>, vector<8x128xf32> -> vector<8x128xf32>
    %26 = vector.shape_cast %25 : vector<8x128xf32> to vector<1x8x128xf32>
    %c0_10 = arith.constant 0 : index
    %c0_11 = arith.constant 0 : index
    %27 = vector.load %arg5[%c0_10, %c0_11] : memref<1x128xf32, #tpu.memory_space<vmem>>, vector<1x128xf32>
    %c0_12 = arith.constant 0 : index
    %c0_13 = arith.constant 0 : index
    %28 = vector.load %arg4[%c0_12, %c0_13] : memref<32x128xbf16, #tpu.memory_space<vmem>>, vector<32x128xbf16>
    %c0_14 = arith.constant 0 : index
    %c0_15 = arith.constant 0 : index
    %29 = vector.load %arg7[%c0_14, %c0_15] : memref<1x32xf32, #tpu.memory_space<vmem>>, vector<1x32xf32>
    %c0_16 = arith.constant 0 : index
    %c0_17 = arith.constant 0 : index
    %30 = vector.load %arg8[%c0_16, %c0_17] : memref<1x32xf32, #tpu.memory_space<vmem>>, vector<1x32xf32>
    %31 = vector.extract_strided_slice %26 {offsets = [0, 0, 0], sizes = [1, 1, 128], strides = [1, 1, 1]} : vector<1x8x128xf32> to vector<1x1x128xf32>
    %32 = vector.shape_cast %31 : vector<1x1x128xf32> to vector<1x128xf32>
    %33 = arith.addf %32, %27 : vector<1x128xf32>
    %34 = arith.truncf %29 : vector<1x32xf32> to vector<1x32xbf16>
    %cst_18 = arith.constant dense<0.000000e+00> : vector<1x128xf32>
    %35 = tpu.matmul %34, %28, %cst_18 {dimension_numbers = #tpu.dot_dimension_numbers<[1], [0], [0], [1], [0, 0, 1, 1], [], []>} : vector<1x32xbf16>, vector<32x128xbf16>, vector<1x128xf32> -> vector<1x128xf32>
    %36 = arith.addf %33, %35 : vector<1x128xf32>
    %37 = vector.extract_strided_slice %36 {offsets = [0, 0], sizes = [1, 32], strides = [1, 1]} : vector<1x128xf32> to vector<1x32xf32>
    %cst_19 = arith.constant 5.000000e-01 : f32
    %38 = vector.broadcast %cst_19 : f32 to vector<1x32xf32>
    %39 = arith.mulf %38, %37 : vector<1x32xf32>
    %40 = math.tanh %39 : vector<1x32xf32>
    %cst_20 = arith.constant 1.000000e+00 : f32
    %41 = vector.broadcast %cst_20 : f32 to vector<1x32xf32>
    %42 = arith.addf %40, %41 : vector<1x32xf32>
    %cst_21 = arith.constant 5.000000e-01 : f32
    %43 = vector.broadcast %cst_21 : f32 to vector<1x32xf32>
    %44 = arith.mulf %43, %42 : vector<1x32xf32>
    %45 = vector.extract_strided_slice %36 {offsets = [0, 32], sizes = [1, 32], strides = [1, 1]} : vector<1x128xf32> to vector<1x32xf32>
    %cst_22 = arith.constant 5.000000e-01 : f32
    %46 = vector.broadcast %cst_22 : f32 to vector<1x32xf32>
    %47 = arith.mulf %46, %45 : vector<1x32xf32>
    %48 = math.tanh %47 : vector<1x32xf32>
    %cst_23 = arith.constant 1.000000e+00 : f32
    %49 = vector.broadcast %cst_23 : f32 to vector<1x32xf32>
    %50 = arith.addf %48, %49 : vector<1x32xf32>
    %cst_24 = arith.constant 5.000000e-01 : f32
    %51 = vector.broadcast %cst_24 : f32 to vector<1x32xf32>
    %52 = arith.mulf %51, %50 : vector<1x32xf32>
    %53 = vector.extract_strided_slice %36 {offsets = [0, 64], sizes = [1, 32], strides = [1, 1]} : vector<1x128xf32> to vector<1x32xf32>
    %54 = math.tanh %53 : vector<1x32xf32>
    %55 = vector.extract_strided_slice %36 {offsets = [0, 96], sizes = [1, 32], strides = [1, 1]} : vector<1x128xf32> to vector<1x32xf32>
    %cst_25 = arith.constant 5.000000e-01 : f32
    %56 = vector.broadcast %cst_25 : f32 to vector<1x32xf32>
    %57 = arith.mulf %56, %55 : vector<1x32xf32>
    %58 = math.tanh %57 : vector<1x32xf32>
    %cst_26 = arith.constant 1.000000e+00 : f32
    %59 = vector.broadcast %cst_26 : f32 to vector<1x32xf32>
    %60 = arith.addf %58, %59 : vector<1x32xf32>
    %cst_27 = arith.constant 5.000000e-01 : f32
    %61 = vector.broadcast %cst_27 : f32 to vector<1x32xf32>
    %62 = arith.mulf %61, %60 : vector<1x32xf32>
    %63 = arith.mulf %52, %30 : vector<1x32xf32>
    %64 = arith.mulf %44, %54 : vector<1x32xf32>
    %65 = arith.addf %63, %64 : vector<1x32xf32>
    %66 = math.tanh %65 : vector<1x32xf32>
    %67 = arith.mulf %62, %66 : vector<1x32xf32>
    %68 = arith.truncf %67 : vector<1x32xf32> to vector<1x32xbf16>
    %c0_28 = arith.constant 0 : index
    %c0_29 = arith.constant 0 : index
    %c0_30 = arith.constant 0 : index
    %69 = vector.load %arg6[%c0_28, %c0_29, %c0_30] : memref<1x8x32xbf16, #tpu.memory_space<vmem>>, vector<1x1x32xbf16>
    %70 = vector.shape_cast %69 : vector<1x1x32xbf16> to vector<1x32xbf16>
    %71 = vector.shape_cast %68 : vector<1x32xbf16> to vector<1x1x32xbf16>
    tpu.vector_store %arg6[%c0_28, %c0_29, %c0_30], %71 {strides = array<i32>} : memref<1x8x32xbf16, #tpu.memory_space<vmem>>, vector<1x1x32xbf16>,
    %72 = vector.extract_strided_slice %26 {offsets = [0, 1, 0], sizes = [1, 1, 128], strides = [1, 1, 1]} : vector<1x8x128xf32> to vector<1x1x128xf32>
    %73 = vector.shape_cast %72 : vector<1x1x128xf32> to vector<1x128xf32>
    %74 = arith.addf %73, %27 : vector<1x128xf32>
    %75 = arith.truncf %67 : vector<1x32xf32> to vector<1x32xbf16>
    %cst_31 = arith.constant dense<0.000000e+00> : vector<1x128xf32>
    %76 = tpu.matmul %75, %28, %cst_31 {dimension_numbers = #tpu.dot_dimension_numbers<[1], [0], [0], [1], [0, 0, 1, 1], [], []>} : vector<1x32xbf16>, vector<32x128xbf16>, vector<1x128xf32> -> vector<1x128xf32>
    %77 = arith.addf %74, %76 : vector<1x128xf32>
    %78 = vector.extract_strided_slice %77 {offsets = [0, 0], sizes = [1, 32], strides = [1, 1]} : vector<1x128xf32> to vector<1x32xf32>
    %cst_32 = arith.constant 5.000000e-01 : f32
    %79 = vector.broadcast %cst_32 : f32 to vector<1x32xf32>
    %80 = arith.mulf %79, %78 : vector<1x32xf32>
    %81 = math.tanh %80 : vector<1x32xf32>
    %cst_33 = arith.constant 1.000000e+00 : f32
    %82 = vector.broadcast %cst_33 : f32 to vector<1x32xf32>
    %83 = arith.addf %81, %82 : vector<1x32xf32>
    %cst_34 = arith.constant 5.000000e-01 : f32
    %84 = vector.broadcast %cst_34 : f32 to vector<1x32xf32>
    %85 = arith.mulf %84, %83 : vector<1x32xf32>
    %86 = vector.extract_strided_slice %77 {offsets = [0, 32], sizes = [1, 32], strides = [1, 1]} : vector<1x128xf32> to vector<1x32xf32>
    %cst_35 = arith.constant 5.000000e-01 : f32
    %87 = vector.broadcast %cst_35 : f32 to vector<1x32xf32>
    %88 = arith.mulf %87, %86 : vector<1x32xf32>
    %89 = math.tanh %88 : vector<1x32xf32>
    %cst_36 = arith.constant 1.000000e+00 : f32
    %90 = vector.broadcast %cst_36 : f32 to vector<1x32xf32>
    %91 = arith.addf %89, %90 : vector<1x32xf32>
    %cst_37 = arith.constant 5.000000e-01 : f32
    %92 = vector.broadcast %cst_37 : f32 to vector<1x32xf32>
    %93 = arith.mulf %92, %91 : vector<1x32xf32>
    %94 = vector.extract_strided_slice %77 {offsets = [0, 64], sizes = [1, 32], strides = [1, 1]} : vector<1x128xf32> to vector<1x32xf32>
    %95 = math.tanh %94 : vector<1x32xf32>
    %96 = vector.extract_strided_slice %77 {offsets = [0, 96], sizes = [1, 32], strides = [1, 1]} : vector<1x128xf32> to vector<1x32xf32>
    %cst_38 = arith.constant 5.000000e-01 : f32
    %97 = vector.broadcast %cst_38 : f32 to vector<1x32xf32>
    %98 = arith.mulf %97, %96 : vector<1x32xf32>
    %99 = math.tanh %98 : vector<1x32xf32>
    %cst_39 = arith.constant 1.000000e+00 : f32
    %100 = vector.broadcast %cst_39 : f32 to vector<1x32xf32>
    %101 = arith.addf %99, %100 : vector<1x32xf32>
    %cst_40 = arith.constant 5.000000e-01 : f32
    %102 = vector.broadcast %cst_40 : f32 to vector<1x32xf32>
    %103 = arith.mulf %102, %101 : vector<1x32xf32>
    %104 = arith.mulf %93, %65 : vector<1x32xf32>
    %105 = arith.mulf %85, %95 : vector<1x32xf32>
    %106 = arith.addf %104, %105 : vector<1x32xf32>
    %107 = math.tanh %106 : vector<1x32xf32>
    %108 = arith.mulf %103, %107 : vector<1x32xf32>
    %109 = arith.truncf %108 : vector<1x32xf32> to vector<1x32xbf16>
    %c0_41 = arith.constant 0 : index
    %c1 = arith.constant 1 : index
    %c0_42 = arith.constant 0 : index
    %110 = vector.load %arg6[%c0_41, %c1, %c0_42] : memref<1x8x32xbf16, #tpu.memory_space<vmem>>, vector<1x1x32xbf16>
    %111 = vector.shape_cast %110 : vector<1x1x32xbf16> to vector<1x32xbf16>
    %112 = vector.shape_cast %109 : vector<1x32xbf16> to vector<1x1x32xbf16>
    tpu.vector_store %arg6[%c0_41, %c1, %c0_42], %112 {strides = array<i32>} : memref<1x8x32xbf16, #tpu.memory_space<vmem>>, vector<1x1x32xbf16>,
    %113 = vector.extract_strided_slice %26 {offsets = [0, 2, 0], sizes = [1, 1, 128], strides = [1, 1, 1]} : vector<1x8x128xf32> to vector<1x1x128xf32>
    %114 = vector.shape_cast %113 : vector<1x1x128xf32> to vector<1x128xf32>
    %115 = arith.addf %114, %27 : vector<1x128xf32>
    %116 = arith.truncf %108 : vector<1x32xf32> to vector<1x32xbf16>
    %cst_43 = arith.constant dense<0.000000e+00> : vector<1x128xf32>
    %117 = tpu.matmul %116, %28, %cst_43 {dimension_numbers = #tpu.dot_dimension_numbers<[1], [0], [0], [1], [0, 0, 1, 1], [], []>} : vector<1x32xbf16>, vector<32x128xbf16>, vector<1x128xf32> -> vector<1x128xf32>
    %118 = arith.addf %115, %117 : vector<1x128xf32>
    %119 = vector.extract_strided_slice %118 {offsets = [0, 0], sizes = [1, 32], strides = [1, 1]} : vector<1x128xf32> to vector<1x32xf32>
    %cst_44 = arith.constant 5.000000e-01 : f32
    %120 = vector.broadcast %cst_44 : f32 to vector<1x32xf32>
    %121 = arith.mulf %120, %119 : vector<1x32xf32>
    %122 = math.tanh %121 : vector<1x32xf32>
    %cst_45 = arith.constant 1.000000e+00 : f32
    %123 = vector.broadcast %cst_45 : f32 to vector<1x32xf32>
    %124 = arith.addf %122, %123 : vector<1x32xf32>
    %cst_46 = arith.constant 5.000000e-01 : f32
    %125 = vector.broadcast %cst_46 : f32 to vector<1x32xf32>
    %126 = arith.mulf %125, %124 : vector<1x32xf32>
    %127 = vector.extract_strided_slice %118 {offsets = [0, 32], sizes = [1, 32], strides = [1, 1]} : vector<1x128xf32> to vector<1x32xf32>
    %cst_47 = arith.constant 5.000000e-01 : f32
    %128 = vector.broadcast %cst_47 : f32 to vector<1x32xf32>
    %129 = arith.mulf %128, %127 : vector<1x32xf32>
    %130 = math.tanh %129 : vector<1x32xf32>
    %cst_48 = arith.constant 1.000000e+00 : f32
    %131 = vector.broadcast %cst_48 : f32 to vector<1x32xf32>
    %132 = arith.addf %130, %131 : vector<1x32xf32>
    %cst_49 = arith.constant 5.000000e-01 : f32
    %133 = vector.broadcast %cst_49 : f32 to vector<1x32xf32>
    %134 = arith.mulf %133, %132 : vector<1x32xf32>
    %135 = vector.extract_strided_slice %118 {offsets = [0, 64], sizes = [1, 32], strides = [1, 1]} : vector<1x128xf32> to vector<1x32xf32>
    %136 = math.tanh %135 : vector<1x32xf32>
    %137 = vector.extract_strided_slice %118 {offsets = [0, 96], sizes = [1, 32], strides = [1, 1]} : vector<1x128xf32> to vector<1x32xf32>
    %cst_50 = arith.constant 5.000000e-01 : f32
    %138 = vector.broadcast %cst_50 : f32 to vector<1x32xf32>
    %139 = arith.mulf %138, %137 : vector<1x32xf32>
    %140 = math.tanh %139 : vector<1x32xf32>
    %cst_51 = arith.constant 1.000000e+00 : f32
    %141 = vector.broadcast %cst_51 : f32 to vector<1x32xf32>
    %142 = arith.addf %140, %141 : vector<1x32xf32>
    %cst_52 = arith.constant 5.000000e-01 : f32
    %143 = vector.broadcast %cst_52 : f32 to vector<1x32xf32>
    %144 = arith.mulf %143, %142 : vector<1x32xf32>
    %145 = arith.mulf %134, %106 : vector<1x32xf32>
    %146 = arith.mulf %126, %136 : vector<1x32xf32>
    %147 = arith.addf %145, %146 : vector<1x32xf32>
    %148 = math.tanh %147 : vector<1x32xf32>
    %149 = arith.mulf %144, %148 : vector<1x32xf32>
    %150 = arith.truncf %149 : vector<1x32xf32> to vector<1x32xbf16>
    %c0_53 = arith.constant 0 : index
    %c2 = arith.constant 2 : index
    %c0_54 = arith.constant 0 : index
    %151 = vector.load %arg6[%c0_53, %c2, %c0_54] : memref<1x8x32xbf16, #tpu.memory_space<vmem>>, vector<1x1x32xbf16>
    %152 = vector.shape_cast %151 : vector<1x1x32xbf16> to vector<1x32xbf16>
    %153 = vector.shape_cast %150 : vector<1x32xbf16> to vector<1x1x32xbf16>
    tpu.vector_store %arg6[%c0_53, %c2, %c0_54], %153 {strides = array<i32>} : memref<1x8x32xbf16, #tpu.memory_space<vmem>>, vector<1x1x32xbf16>,
    %154 = vector.extract_strided_slice %26 {offsets = [0, 3, 0], sizes = [1, 1, 128], strides = [1, 1, 1]} : vector<1x8x128xf32> to vector<1x1x128xf32>
    %155 = vector.shape_cast %154 : vector<1x1x128xf32> to vector<1x128xf32>
    %156 = arith.addf %155, %27 : vector<1x128xf32>
    %157 = arith.truncf %149 : vector<1x32xf32> to vector<1x32xbf16>
    %cst_55 = arith.constant dense<0.000000e+00> : vector<1x128xf32>
    %158 = tpu.matmul %157, %28, %cst_55 {dimension_numbers = #tpu.dot_dimension_numbers<[1], [0], [0], [1], [0, 0, 1, 1], [], []>} : vector<1x32xbf16>, vector<32x128xbf16>, vector<1x128xf32> -> vector<1x128xf32>
    %159 = arith.addf %156, %158 : vector<1x128xf32>
    %160 = vector.extract_strided_slice %159 {offsets = [0, 0], sizes = [1, 32], strides = [1, 1]} : vector<1x128xf32> to vector<1x32xf32>
    %cst_56 = arith.constant 5.000000e-01 : f32
    %161 = vector.broadcast %cst_56 : f32 to vector<1x32xf32>
    %162 = arith.mulf %161, %160 : vector<1x32xf32>
    %163 = math.tanh %162 : vector<1x32xf32>
    %cst_57 = arith.constant 1.000000e+00 : f32
    %164 = vector.broadcast %cst_57 : f32 to vector<1x32xf32>
    %165 = arith.addf %163, %164 : vector<1x32xf32>
    %cst_58 = arith.constant 5.000000e-01 : f32
    %166 = vector.broadcast %cst_58 : f32 to vector<1x32xf32>
    %167 = arith.mulf %166, %165 : vector<1x32xf32>
    %168 = vector.extract_strided_slice %159 {offsets = [0, 32], sizes = [1, 32], strides = [1, 1]} : vector<1x128xf32> to vector<1x32xf32>
    %cst_59 = arith.constant 5.000000e-01 : f32
    %169 = vector.broadcast %cst_59 : f32 to vector<1x32xf32>
    %170 = arith.mulf %169, %168 : vector<1x32xf32>
    %171 = math.tanh %170 : vector<1x32xf32>
    %cst_60 = arith.constant 1.000000e+00 : f32
    %172 = vector.broadcast %cst_60 : f32 to vector<1x32xf32>
    %173 = arith.addf %171, %172 : vector<1x32xf32>
    %cst_61 = arith.constant 5.000000e-01 : f32
    %174 = vector.broadcast %cst_61 : f32 to vector<1x32xf32>
    %175 = arith.mulf %174, %173 : vector<1x32xf32>
    %176 = vector.extract_strided_slice %159 {offsets = [0, 64], sizes = [1, 32], strides = [1, 1]} : vector<1x128xf32> to vector<1x32xf32>
    %177 = math.tanh %176 : vector<1x32xf32>
    %178 = vector.extract_strided_slice %159 {offsets = [0, 96], sizes = [1, 32], strides = [1, 1]} : vector<1x128xf32> to vector<1x32xf32>
    %cst_62 = arith.constant 5.000000e-01 : f32
    %179 = vector.broadcast %cst_62 : f32 to vector<1x32xf32>
    %180 = arith.mulf %179, %178 : vector<1x32xf32>
    %181 = math.tanh %180 : vector<1x32xf32>
    %cst_63 = arith.constant 1.000000e+00 : f32
    %182 = vector.broadcast %cst_63 : f32 to vector<1x32xf32>
    %183 = arith.addf %181, %182 : vector<1x32xf32>
    %cst_64 = arith.constant 5.000000e-01 : f32
    %184 = vector.broadcast %cst_64 : f32 to vector<1x32xf32>
    %185 = arith.mulf %184, %183 : vector<1x32xf32>
    %186 = arith.mulf %175, %147 : vector<1x32xf32>
    %187 = arith.mulf %167, %177 : vector<1x32xf32>
    %188 = arith.addf %186, %187 : vector<1x32xf32>
    %189 = math.tanh %188 : vector<1x32xf32>
    %190 = arith.mulf %185, %189 : vector<1x32xf32>
    %191 = arith.truncf %190 : vector<1x32xf32> to vector<1x32xbf16>
    %c0_65 = arith.constant 0 : index
    %c3 = arith.constant 3 : index
    %c0_66 = arith.constant 0 : index
    %192 = vector.load %arg6[%c0_65, %c3, %c0_66] : memref<1x8x32xbf16, #tpu.memory_space<vmem>>, vector<1x1x32xbf16>
    %193 = vector.shape_cast %192 : vector<1x1x32xbf16> to vector<1x32xbf16>
    %194 = vector.shape_cast %191 : vector<1x32xbf16> to vector<1x1x32xbf16>
    tpu.vector_store %arg6[%c0_65, %c3, %c0_66], %194 {strides = array<i32>} : memref<1x8x32xbf16, #tpu.memory_space<vmem>>, vector<1x1x32xbf16>,
    %195 = vector.extract_strided_slice %26 {offsets = [0, 4, 0], sizes = [1, 1, 128], strides = [1, 1, 1]} : vector<1x8x128xf32> to vector<1x1x128xf32>
    %196 = vector.shape_cast %195 : vector<1x1x128xf32> to vector<1x128xf32>
    %197 = arith.addf %196, %27 : vector<1x128xf32>
    %198 = arith.truncf %190 : vector<1x32xf32> to vector<1x32xbf16>
    %cst_67 = arith.constant dense<0.000000e+00> : vector<1x128xf32>
    %199 = tpu.matmul %198, %28, %cst_67 {dimension_numbers = #tpu.dot_dimension_numbers<[1], [0], [0], [1], [0, 0, 1, 1], [], []>} : vector<1x32xbf16>, vector<32x128xbf16>, vector<1x128xf32> -> vector<1x128xf32>
    %200 = arith.addf %197, %199 : vector<1x128xf32>
    %201 = vector.extract_strided_slice %200 {offsets = [0, 0], sizes = [1, 32], strides = [1, 1]} : vector<1x128xf32> to vector<1x32xf32>
    %cst_68 = arith.constant 5.000000e-01 : f32
    %202 = vector.broadcast %cst_68 : f32 to vector<1x32xf32>
    %203 = arith.mulf %202, %201 : vector<1x32xf32>
    %204 = math.tanh %203 : vector<1x32xf32>
    %cst_69 = arith.constant 1.000000e+00 : f32
    %205 = vector.broadcast %cst_69 : f32 to vector<1x32xf32>
    %206 = arith.addf %204, %205 : vector<1x32xf32>
    %cst_70 = arith.constant 5.000000e-01 : f32
    %207 = vector.broadcast %cst_70 : f32 to vector<1x32xf32>
    %208 = arith.mulf %207, %206 : vector<1x32xf32>
    %209 = vector.extract_strided_slice %200 {offsets = [0, 32], sizes = [1, 32], strides = [1, 1]} : vector<1x128xf32> to vector<1x32xf32>
    %cst_71 = arith.constant 5.000000e-01 : f32
    %210 = vector.broadcast %cst_71 : f32 to vector<1x32xf32>
    %211 = arith.mulf %210, %209 : vector<1x32xf32>
    %212 = math.tanh %211 : vector<1x32xf32>
    %cst_72 = arith.constant 1.000000e+00 : f32
    %213 = vector.broadcast %cst_72 : f32 to vector<1x32xf32>
    %214 = arith.addf %212, %213 : vector<1x32xf32>
    %cst_73 = arith.constant 5.000000e-01 : f32
    %215 = vector.broadcast %cst_73 : f32 to vector<1x32xf32>
    %216 = arith.mulf %215, %214 : vector<1x32xf32>
    %217 = vector.extract_strided_slice %200 {offsets = [0, 64], sizes = [1, 32], strides = [1, 1]} : vector<1x128xf32> to vector<1x32xf32>
    %218 = math.tanh %217 : vector<1x32xf32>
    %219 = vector.extract_strided_slice %200 {offsets = [0, 96], sizes = [1, 32], strides = [1, 1]} : vector<1x128xf32> to vector<1x32xf32>
    %cst_74 = arith.constant 5.000000e-01 : f32
    %220 = vector.broadcast %cst_74 : f32 to vector<1x32xf32>
    %221 = arith.mulf %220, %219 : vector<1x32xf32>
    %222 = math.tanh %221 : vector<1x32xf32>
    %cst_75 = arith.constant 1.000000e+00 : f32
    %223 = vector.broadcast %cst_75 : f32 to vector<1x32xf32>
    %224 = arith.addf %222, %223 : vector<1x32xf32>
    %cst_76 = arith.constant 5.000000e-01 : f32
    %225 = vector.broadcast %cst_76 : f32 to vector<1x32xf32>
    %226 = arith.mulf %225, %224 : vector<1x32xf32>
    %227 = arith.mulf %216, %188 : vector<1x32xf32>
    %228 = arith.mulf %208, %218 : vector<1x32xf32>
    %229 = arith.addf %227, %228 : vector<1x32xf32>
    %230 = math.tanh %229 : vector<1x32xf32>
    %231 = arith.mulf %226, %230 : vector<1x32xf32>
    %232 = arith.truncf %231 : vector<1x32xf32> to vector<1x32xbf16>
    %c0_77 = arith.constant 0 : index
    %c4 = arith.constant 4 : index
    %c0_78 = arith.constant 0 : index
    %233 = vector.load %arg6[%c0_77, %c4, %c0_78] : memref<1x8x32xbf16, #tpu.memory_space<vmem>>, vector<1x1x32xbf16>
    %234 = vector.shape_cast %233 : vector<1x1x32xbf16> to vector<1x32xbf16>
    %235 = vector.shape_cast %232 : vector<1x32xbf16> to vector<1x1x32xbf16>
    tpu.vector_store %arg6[%c0_77, %c4, %c0_78], %235 {strides = array<i32>} : memref<1x8x32xbf16, #tpu.memory_space<vmem>>, vector<1x1x32xbf16>,
    %236 = vector.extract_strided_slice %26 {offsets = [0, 5, 0], sizes = [1, 1, 128], strides = [1, 1, 1]} : vector<1x8x128xf32> to vector<1x1x128xf32>
    %237 = vector.shape_cast %236 : vector<1x1x128xf32> to vector<1x128xf32>
    %238 = arith.addf %237, %27 : vector<1x128xf32>
    %239 = arith.truncf %231 : vector<1x32xf32> to vector<1x32xbf16>
    %cst_79 = arith.constant dense<0.000000e+00> : vector<1x128xf32>
    %240 = tpu.matmul %239, %28, %cst_79 {dimension_numbers = #tpu.dot_dimension_numbers<[1], [0], [0], [1], [0, 0, 1, 1], [], []>} : vector<1x32xbf16>, vector<32x128xbf16>, vector<1x128xf32> -> vector<1x128xf32>
    %241 = arith.addf %238, %240 : vector<1x128xf32>
    %242 = vector.extract_strided_slice %241 {offsets = [0, 0], sizes = [1, 32], strides = [1, 1]} : vector<1x128xf32> to vector<1x32xf32>
    %cst_80 = arith.constant 5.000000e-01 : f32
    %243 = vector.broadcast %cst_80 : f32 to vector<1x32xf32>
    %244 = arith.mulf %243, %242 : vector<1x32xf32>
    %245 = math.tanh %244 : vector<1x32xf32>
    %cst_81 = arith.constant 1.000000e+00 : f32
    %246 = vector.broadcast %cst_81 : f32 to vector<1x32xf32>
    %247 = arith.addf %245, %246 : vector<1x32xf32>
    %cst_82 = arith.constant 5.000000e-01 : f32
    %248 = vector.broadcast %cst_82 : f32 to vector<1x32xf32>
    %249 = arith.mulf %248, %247 : vector<1x32xf32>
    %250 = vector.extract_strided_slice %241 {offsets = [0, 32], sizes = [1, 32], strides = [1, 1]} : vector<1x128xf32> to vector<1x32xf32>
    %cst_83 = arith.constant 5.000000e-01 : f32
    %251 = vector.broadcast %cst_83 : f32 to vector<1x32xf32>
    %252 = arith.mulf %251, %250 : vector<1x32xf32>
    %253 = math.tanh %252 : vector<1x32xf32>
    %cst_84 = arith.constant 1.000000e+00 : f32
    %254 = vector.broadcast %cst_84 : f32 to vector<1x32xf32>
    %255 = arith.addf %253, %254 : vector<1x32xf32>
    %cst_85 = arith.constant 5.000000e-01 : f32
    %256 = vector.broadcast %cst_85 : f32 to vector<1x32xf32>
    %257 = arith.mulf %256, %255 : vector<1x32xf32>
    %258 = vector.extract_strided_slice %241 {offsets = [0, 64], sizes = [1, 32], strides = [1, 1]} : vector<1x128xf32> to vector<1x32xf32>
    %259 = math.tanh %258 : vector<1x32xf32>
    %260 = vector.extract_strided_slice %241 {offsets = [0, 96], sizes = [1, 32], strides = [1, 1]} : vector<1x128xf32> to vector<1x32xf32>
    %cst_86 = arith.constant 5.000000e-01 : f32
    %261 = vector.broadcast %cst_86 : f32 to vector<1x32xf32>
    %262 = arith.mulf %261, %260 : vector<1x32xf32>
    %263 = math.tanh %262 : vector<1x32xf32>
    %cst_87 = arith.constant 1.000000e+00 : f32
    %264 = vector.broadcast %cst_87 : f32 to vector<1x32xf32>
    %265 = arith.addf %263, %264 : vector<1x32xf32>
    %cst_88 = arith.constant 5.000000e-01 : f32
    %266 = vector.broadcast %cst_88 : f32 to vector<1x32xf32>
    %267 = arith.mulf %266, %265 : vector<1x32xf32>
    %268 = arith.mulf %257, %229 : vector<1x32xf32>
    %269 = arith.mulf %249, %259 : vector<1x32xf32>
    %270 = arith.addf %268, %269 : vector<1x32xf32>
    %271 = math.tanh %270 : vector<1x32xf32>
    %272 = arith.mulf %267, %271 : vector<1x32xf32>
    %273 = arith.truncf %272 : vector<1x32xf32> to vector<1x32xbf16>
    %c0_89 = arith.constant 0 : index
    %c5 = arith.constant 5 : index
    %c0_90 = arith.constant 0 : index
    %274 = vector.load %arg6[%c0_89, %c5, %c0_90] : memref<1x8x32xbf16, #tpu.memory_space<vmem>>, vector<1x1x32xbf16>
    %275 = vector.shape_cast %274 : vector<1x1x32xbf16> to vector<1x32xbf16>
    %276 = vector.shape_cast %273 : vector<1x32xbf16> to vector<1x1x32xbf16>
    tpu.vector_store %arg6[%c0_89, %c5, %c0_90], %276 {strides = array<i32>} : memref<1x8x32xbf16, #tpu.memory_space<vmem>>, vector<1x1x32xbf16>,
    %277 = vector.extract_strided_slice %26 {offsets = [0, 6, 0], sizes = [1, 1, 128], strides = [1, 1, 1]} : vector<1x8x128xf32> to vector<1x1x128xf32>
    %278 = vector.shape_cast %277 : vector<1x1x128xf32> to vector<1x128xf32>
    %279 = arith.addf %278, %27 : vector<1x128xf32>
    %280 = arith.truncf %272 : vector<1x32xf32> to vector<1x32xbf16>
    %cst_91 = arith.constant dense<0.000000e+00> : vector<1x128xf32>
    %281 = tpu.matmul %280, %28, %cst_91 {dimension_numbers = #tpu.dot_dimension_numbers<[1], [0], [0], [1], [0, 0, 1, 1], [], []>} : vector<1x32xbf16>, vector<32x128xbf16>, vector<1x128xf32> -> vector<1x128xf32>
    %282 = arith.addf %279, %281 : vector<1x128xf32>
    %283 = vector.extract_strided_slice %282 {offsets = [0, 0], sizes = [1, 32], strides = [1, 1]} : vector<1x128xf32> to vector<1x32xf32>
    %cst_92 = arith.constant 5.000000e-01 : f32
    %284 = vector.broadcast %cst_92 : f32 to vector<1x32xf32>
    %285 = arith.mulf %284, %283 : vector<1x32xf32>
    %286 = math.tanh %285 : vector<1x32xf32>
    %cst_93 = arith.constant 1.000000e+00 : f32
    %287 = vector.broadcast %cst_93 : f32 to vector<1x32xf32>
    %288 = arith.addf %286, %287 : vector<1x32xf32>
    %cst_94 = arith.constant 5.000000e-01 : f32
    %289 = vector.broadcast %cst_94 : f32 to vector<1x32xf32>
    %290 = arith.mulf %289, %288 : vector<1x32xf32>
    %291 = vector.extract_strided_slice %282 {offsets = [0, 32], sizes = [1, 32], strides = [1, 1]} : vector<1x128xf32> to vector<1x32xf32>
    %cst_95 = arith.constant 5.000000e-01 : f32
    %292 = vector.broadcast %cst_95 : f32 to vector<1x32xf32>
    %293 = arith.mulf %292, %291 : vector<1x32xf32>
    %294 = math.tanh %293 : vector<1x32xf32>
    %cst_96 = arith.constant 1.000000e+00 : f32
    %295 = vector.broadcast %cst_96 : f32 to vector<1x32xf32>
    %296 = arith.addf %294, %295 : vector<1x32xf32>
    %cst_97 = arith.constant 5.000000e-01 : f32
    %297 = vector.broadcast %cst_97 : f32 to vector<1x32xf32>
    %298 = arith.mulf %297, %296 : vector<1x32xf32>
    %299 = vector.extract_strided_slice %282 {offsets = [0, 64], sizes = [1, 32], strides = [1, 1]} : vector<1x128xf32> to vector<1x32xf32>
    %300 = math.tanh %299 : vector<1x32xf32>
    %301 = vector.extract_strided_slice %282 {offsets = [0, 96], sizes = [1, 32], strides = [1, 1]} : vector<1x128xf32> to vector<1x32xf32>
    %cst_98 = arith.constant 5.000000e-01 : f32
    %302 = vector.broadcast %cst_98 : f32 to vector<1x32xf32>
    %303 = arith.mulf %302, %301 : vector<1x32xf32>
    %304 = math.tanh %303 : vector<1x32xf32>
    %cst_99 = arith.constant 1.000000e+00 : f32
    %305 = vector.broadcast %cst_99 : f32 to vector<1x32xf32>
    %306 = arith.addf %304, %305 : vector<1x32xf32>
    %cst_100 = arith.constant 5.000000e-01 : f32
    %307 = vector.broadcast %cst_100 : f32 to vector<1x32xf32>
    %308 = arith.mulf %307, %306 : vector<1x32xf32>
    %309 = arith.mulf %298, %270 : vector<1x32xf32>
    %310 = arith.mulf %290, %300 : vector<1x32xf32>
    %311 = arith.addf %309, %310 : vector<1x32xf32>
    %312 = math.tanh %311 : vector<1x32xf32>
    %313 = arith.mulf %308, %312 : vector<1x32xf32>
    %314 = arith.truncf %313 : vector<1x32xf32> to vector<1x32xbf16>
    %c0_101 = arith.constant 0 : index
    %c6 = arith.constant 6 : index
    %c0_102 = arith.constant 0 : index
    %315 = vector.load %arg6[%c0_101, %c6, %c0_102] : memref<1x8x32xbf16, #tpu.memory_space<vmem>>, vector<1x1x32xbf16>
    %316 = vector.shape_cast %315 : vector<1x1x32xbf16> to vector<1x32xbf16>
    %317 = vector.shape_cast %314 : vector<1x32xbf16> to vector<1x1x32xbf16>
    tpu.vector_store %arg6[%c0_101, %c6, %c0_102], %317 {strides = array<i32>} : memref<1x8x32xbf16, #tpu.memory_space<vmem>>, vector<1x1x32xbf16>,
    %318 = vector.extract_strided_slice %26 {offsets = [0, 7, 0], sizes = [1, 1, 128], strides = [1, 1, 1]} : vector<1x8x128xf32> to vector<1x1x128xf32>
    %319 = vector.shape_cast %318 : vector<1x1x128xf32> to vector<1x128xf32>
    %320 = arith.addf %319, %27 : vector<1x128xf32>
    %321 = arith.truncf %313 : vector<1x32xf32> to vector<1x32xbf16>
    %cst_103 = arith.constant dense<0.000000e+00> : vector<1x128xf32>
    %322 = tpu.matmul %321, %28, %cst_103 {dimension_numbers = #tpu.dot_dimension_numbers<[1], [0], [0], [1], [0, 0, 1, 1], [], []>} : vector<1x32xbf16>, vector<32x128xbf16>, vector<1x128xf32> -> vector<1x128xf32>
    %323 = arith.addf %320, %322 : vector<1x128xf32>
    %324 = vector.extract_strided_slice %323 {offsets = [0, 0], sizes = [1, 32], strides = [1, 1]} : vector<1x128xf32> to vector<1x32xf32>
    %cst_104 = arith.constant 5.000000e-01 : f32
    %325 = vector.broadcast %cst_104 : f32 to vector<1x32xf32>
    %326 = arith.mulf %325, %324 : vector<1x32xf32>
    %327 = math.tanh %326 : vector<1x32xf32>
    %cst_105 = arith.constant 1.000000e+00 : f32
    %328 = vector.broadcast %cst_105 : f32 to vector<1x32xf32>
    %329 = arith.addf %327, %328 : vector<1x32xf32>
    %cst_106 = arith.constant 5.000000e-01 : f32
    %330 = vector.broadcast %cst_106 : f32 to vector<1x32xf32>
    %331 = arith.mulf %330, %329 : vector<1x32xf32>
    %332 = vector.extract_strided_slice %323 {offsets = [0, 32], sizes = [1, 32], strides = [1, 1]} : vector<1x128xf32> to vector<1x32xf32>
    %cst_107 = arith.constant 5.000000e-01 : f32
    %333 = vector.broadcast %cst_107 : f32 to vector<1x32xf32>
    %334 = arith.mulf %333, %332 : vector<1x32xf32>
    %335 = math.tanh %334 : vector<1x32xf32>
    %cst_108 = arith.constant 1.000000e+00 : f32
    %336 = vector.broadcast %cst_108 : f32 to vector<1x32xf32>
    %337 = arith.addf %335, %336 : vector<1x32xf32>
    %cst_109 = arith.constant 5.000000e-01 : f32
    %338 = vector.broadcast %cst_109 : f32 to vector<1x32xf32>
    %339 = arith.mulf %338, %337 : vector<1x32xf32>
    %340 = vector.extract_strided_slice %323 {offsets = [0, 64], sizes = [1, 32], strides = [1, 1]} : vector<1x128xf32> to vector<1x32xf32>
    %341 = math.tanh %340 : vector<1x32xf32>
    %342 = vector.extract_strided_slice %323 {offsets = [0, 96], sizes = [1, 32], strides = [1, 1]} : vector<1x128xf32> to vector<1x32xf32>
    %cst_110 = arith.constant 5.000000e-01 : f32
    %343 = vector.broadcast %cst_110 : f32 to vector<1x32xf32>
    %344 = arith.mulf %343, %342 : vector<1x32xf32>
    %345 = math.tanh %344 : vector<1x32xf32>
    %cst_111 = arith.constant 1.000000e+00 : f32
    %346 = vector.broadcast %cst_111 : f32 to vector<1x32xf32>
    %347 = arith.addf %345, %346 : vector<1x32xf32>
    %cst_112 = arith.constant 5.000000e-01 : f32
    %348 = vector.broadcast %cst_112 : f32 to vector<1x32xf32>
    %349 = arith.mulf %348, %347 : vector<1x32xf32>
    %350 = arith.mulf %339, %311 : vector<1x32xf32>
    %351 = arith.mulf %331, %341 : vector<1x32xf32>
    %352 = arith.addf %350, %351 : vector<1x32xf32>
    %353 = math.tanh %352 : vector<1x32xf32>
    %354 = arith.mulf %349, %353 : vector<1x32xf32>
    %355 = arith.truncf %354 : vector<1x32xf32> to vector<1x32xbf16>
    %c0_113 = arith.constant 0 : index
    %c7 = arith.constant 7 : index
    %c0_114 = arith.constant 0 : index
    %356 = vector.load %arg6[%c0_113, %c7, %c0_114] : memref<1x8x32xbf16, #tpu.memory_space<vmem>>, vector<1x1x32xbf16>
    %357 = vector.shape_cast %356 : vector<1x1x32xbf16> to vector<1x32xbf16>
    %358 = vector.shape_cast %355 : vector<1x32xbf16> to vector<1x1x32xbf16>
    tpu.vector_store %arg6[%c0_113, %c7, %c0_114], %358 {strides = array<i32>} : memref<1x8x32xbf16, #tpu.memory_space<vmem>>, vector<1x1x32xbf16>,
    %c0_115 = arith.constant 0 : index
    %c0_116 = arith.constant 0 : index
    %359 = vector.load %arg7[%c0_115, %c0_116] : memref<1x32xf32, #tpu.memory_space<vmem>>, vector<1x32xf32>
    tpu.vector_store %arg7[%c0_115, %c0_116], %354 {strides = array<i32>} : memref<1x32xf32, #tpu.memory_space<vmem>>, vector<1x32xf32>,
    %c0_117 = arith.constant 0 : index
    %c0_118 = arith.constant 0 : index
    %360 = vector.load %arg8[%c0_117, %c0_118] : memref<1x32xf32, #tpu.memory_space<vmem>>, vector<1x32xf32>
    tpu.vector_store %arg8[%c0_117, %c0_118], %352 {strides = array<i32>} : memref<1x32xf32, #tpu.memory_space<vmem>>, vector<1x32xf32>,
    return
  }
  func.func @transform_0(%arg0: i32, %arg1: i32) -> (i32, i32, i32) {
    %c0_i32 = arith.constant 0 : i32
    %c0_i32_0 = arith.constant 0 : i32
    return %arg0, %arg1, %c0_i32 : i32, i32, i32
  }
  func.func @transform_1(%arg0: i32, %arg1: i32) -> (i32, i32) {
    %c0_i32 = arith.constant 0 : i32
    %c0_i32_0 = arith.constant 0 : i32
    %c0_i32_1 = arith.constant 0 : i32
    return %c0_i32, %c0_i32_0 : i32, i32
  }
  func.func @transform_2(%arg0: i32, %arg1: i32) -> (i32, i32) {
    %c0_i32 = arith.constant 0 : i32
    %c0_i32_0 = arith.constant 0 : i32
    %c0_i32_1 = arith.constant 0 : i32
    return %c0_i32, %c0_i32_0 : i32, i32
  }
  func.func @transform_3(%arg0: i32, %arg1: i32) -> (i32, i32) {
    %c0_i32 = arith.constant 0 : i32
    %c0_i32_0 = arith.constant 0 : i32
    %c0_i32_1 = arith.constant 0 : i32
    return %c0_i32, %c0_i32_0 : i32, i32
  }
  func.func @transform_4(%arg0: i32, %arg1: i32) -> (i32, i32, i32) {
    %c0_i32 = arith.constant 0 : i32
    %c0_i32_0 = arith.constant 0 : i32
    return %arg0, %arg1, %c0_i32 : i32, i32, i32
  }
}

</mosaic_0001>

<bundles_post_ra>
// kernel: tpu_custom_call.1
= control target key start
LH: loop header
LB: loop body
LE: loop exit
PB: predicated region body
PF: predicated region fallthrough
CT: control target
= control target key end

     0   :  { %9 = vsyncpa [#allocation5], 0  ;;  %s2203_s0 = inlined_call_operand.hbm [shape: f32[2,8,16], index: 0, kind: input, shape index: {}]   ;;  %s2204_s1 = inlined_call_operand.hbm [shape: bf16[16,128], index: 1, kind: input, shape index: {}]   ;;  %s2205_s2 = inlined_call_operand.hbm [shape: bf16[32,128], index: 2, kind: input, shape index: {}]   ;;  %s2206_s3 = inlined_call_operand.hbm [shape: f32[1,128], index: 3, kind: input, shape index: {}]   ;;  %s2207_s4 = inlined_call_operand.hbm [shape: bf16[2,8,32], index: 4, kind: output, shape index: {}]  }
   0x1   :  { %11 = vsyncpa [#allocation5 + $0x1], 0 }
   0x2   :  { %12 = vsyncpa [#allocation8], 0 }
   0x3   :  { %13 = vsyncpa [#allocation11], 0 }
   0x4   :  { %14 = vsyncpa [#allocation6], 0 }
   0x5   :  { %16 = vsyncpa [#allocation6 + $0x1], 0  ;;  %s1758_s15 = smov 0   ;;  %s1760_s16 = smov 0  }
   0x6   :  { %s1762_s17 = smov 0   ;;  %s1764_s18 = smov 0  }
   0x7   :  { %s1766_s19 = smov 0   ;;  %s1768_s20 = smov 0  }
   0x8 LB: > { %s1218_s21 = sadd.s32 4294967295, %s1719_s20   ;;  %s1219_s22 = sadd.s32 4294967294, %s1719_s20   ;;  %s1719_s20 = sphi %s1768_s20, %s22_s20   ;;  %s1715_s19 = sphi %s1766_s19, %s2234_s19   ;;  %s1711_s18 = sphi %s1764_s18, %s2233_s18   ;;  %s1707_s17 = sphi %s1762_s17, %s2232_s17   ;;  %s1703_s16 = sphi %s1760_s16, %s2231_s16   ;;  %s1699_s15 = sphi %s1758_s15, %s2230_s15  }
   0x9   : > { %p56_p0 = scmp.ne.s32.totalorder %s1703_s16, %s1699_s15  ;;  %p1792_p1 = scmp.eq.s32.totalorder %s1218_s21, 0 }
   0xa   : > { %p1796_p2 = scmp.eq.s32.totalorder %s1218_s21, 1  ;;  %p151_p3 = scmp.eq.s32.totalorder %s1219_s22, 1 }
   0xb   : > { %s2213_s23 = scalar_select %p1792_p1, 1, 0 }
   0xc   : > { %s2214_s24 = scalar_select %p1796_p2, 1, 0 }
   0xd   : > { %p1802_p4 = por %p1792_p1, %p56_p0  ;;  %p1220_p5 = scmp.ge.s32.totalorder %s1719_s20, 1 }
   0xe   : > { %p1807_p6 = por %p151_p3, %p56_p0  ;;  %p158_p7 = scmp.lt.s32.totalorder %s1719_s20, 3 }
   0xf   : > { %s2215_s25 = scalar_select %p1802_p4, 1, 0 }
  0x10   : > { %s2216_s26 = scalar_select %p1807_p6, 1, 0 }
  0x11   : > { %p1812_p8 = pnand %p1220_p5, %p158_p7  ;;  %s1721_s28 = smov [#allocation7]  }
  0x12   : > { %2217 = sst [smem:[#allocation17_spill]] %s2216_s26  ;;  %s170_s29 = sshll.u32 %s1721_s28, 4  ;;  %s1816_s29 = int_to_ptr.vmem [resolvable:$true] %s170_s29 }
  0x13   : > { %s2218_s27 = scalar_select %p1812_p8, 1, 0 }
  0x14   : > { %p1378_p9 = pneg %p1812_p8  ;;  %s1722_s5 = smov [#allocation9]  }
  0x15   : > { %s183_s6 = sshll.u32 %s1722_s5, 4  ;;  %s1723_s7 = smov [#allocation10]   ;;  %s1827_s6 = int_to_ptr.vmem [resolvable:$true] %s183_s6 }
  0x16   : > { %p1823_p11 = pnand %p1378_p9, %p1792_p1  ;;  %s1829_s8 = sshll.u32 %s1723_s7, 4  ;;  %s198_s8 = int_to_ptr.vmem [resolvable:$true] %s1829_s8 }
  0x17   : > { %s1515_s11 = scalar_lea.hbm %s2204_s1, 128 }
  0x18   : > { %p1516_p12 = scmp.ne.s32.totalorder %s2204_s1, %s1515_s11  ;;  %p1839_p13 = pneg %p1823_p11 }
  0x19   : > { %p1522_p5 = scmp.lt.u32.totalorder %s1515_s11, %s2204_s1 }
  0x1a   : > { %p1518_p0 = pnand %p1839_p13, %p1516_p12 }
  0x1c   : > { %p1519_p3 = pneg %p1518_p0 }
  0x1e   : > { %p1524_p7 = pnand %p1522_p5, %p1519_p3 }
  0x20   : > { %1527 = shalt.err (!%p1524_p7)
}
  0x21   : > { %s1528_s28 = scalar_lea.vmem %s1816_s29, 128  ;;  %p1536_p1 = scmp.lt.s32.totalorder %s1816_s29, %s1816_s29 }
  0x22   : > { %p1529_p9 = scmp.ne.s32.totalorder %s1816_s29, %s1528_s28  ;;  %p1537_p4 = scmp.lt.s32.totalorder %s1528_s28, %s1528_s28 }
  0x24   : > { %p1531_p10 = pnand %p1529_p9, %p1839_p13  ;;  %p1538_p12 = por %p1537_p4, %p1536_p1 }
  0x26   : > { %p1532_p6 = pneg %p1531_p10 }
  0x28   : > { %p1539_p0 = pnand %p1538_p12, %p1532_p6 }
  0x2a   : > { %1542 = shalt.err (!%p1539_p0)
}
  0x2b   : > { %s1724_s5 = smov 64   ;;  %s1725_s7 = smov 4  }
  0x2c   : > { %1381 = dma.hbm_to_vmem [thread:$0]  (!%p1823_p11), %s2204_s1, 128, %s1816_s29, [#allocation8], %s1724_s5, %s1724_s5, %s1725_s7  }
  0x2d   : > { %s1543_s13 = scalar_lea.hbm %s2205_s2, 256 }
  0x2e   : > { %p1544_p1 = scmp.ne.s32.totalorder %s2205_s2, %s1543_s13  ;;  %p1550_p10 = scmp.lt.u32.totalorder %s1543_s13, %s2205_s2 }
  0x30   : > { %p1546_p4 = pnand %p1544_p1, %p1839_p13 }
  0x32   : > { %p1547_p6 = pneg %p1546_p4 }
  0x34   : > { %p1552_p3 = pnand %p1550_p10, %p1547_p6 }
  0x36   : > { %1555 = shalt.err (!%p1552_p3)
}
  0x37   : > { %s1556_s29 = scalar_lea.vmem %s1827_s6, 256  ;;  %p1564_p12 = scmp.lt.s32.totalorder %s1827_s6, %s1827_s6 }
  0x38   : > { %p1557_p5 = scmp.ne.s32.totalorder %s1827_s6, %s1556_s29  ;;  %p1565_p0 = scmp.lt.s32.totalorder %s1556_s29, %s1556_s29 }
  0x3a   : > { %p1559_p7 = pnand %p1557_p5, %p1839_p13  ;;  %p1566_p1 = por %p1565_p0, %p1564_p12 }
  0x3c   : > { %p1560_p9 = pneg %p1559_p7 }
  0x3e   : > { %p1567_p4 = pnand %p1566_p1, %p1560_p9 }
  0x40   : > { %1570 = shalt.err (!%p1567_p4)
}
  0x41   : > { %1384 = dma.hbm_to_vmem [thread:$0]  (!%p1823_p11), %s2205_s2, 256, %s1827_s6, [#allocation8], %s1724_s5, %s1724_s5, %s1725_s7  }
  0x42   : > { %s1571_s12 = scalar_lea.hbm %s2206_s3, 16 }
  0x43   : > { %p1572_p6 = scmp.ne.s32.totalorder %s2206_s3, %s1571_s12  ;;  %p1578_p5 = scmp.lt.u32.totalorder %s1571_s12, %s2206_s3 }
  0x45   : > { %p1574_p10 = pnand %p1572_p6, %p1839_p13 }
  0x47   : > { %p1575_p3 = pneg %p1574_p10 }
  0x49   : > { %p1580_p7 = pnand %p1578_p5, %p1575_p3 }
  0x4b   : > { %1583 = shalt.err (!%p1580_p7)
}
  0x4c   : > { %s1584_s29 = scalar_lea.vmem %s198_s8, 16  ;;  %s1591_s6 = scalar_lea.vmem %s198_s8, 32 }
  0x4d   : > { %p1585_p9 = scmp.ne.s32.totalorder %s198_s8, %s1584_s29  ;;  %p1592_p1 = scmp.lt.s32.totalorder %s198_s8, %s198_s8 }
  0x4e   : > { %p1593_p4 = scmp.lt.s32.totalorder %s1591_s6, %s1584_s29 }
  0x4f   : > { %p1587_p12 = pnand %p1585_p9, %p1839_p13 }
  0x50   : > { %p1594_p8 = por %p1593_p4, %p1592_p1 }
  0x51   : > { %p1588_p0 = pneg %p1587_p12 }
  0x53   : > { %p1595_p2 = pnand %p1594_p8, %p1588_p0 }
  0x55   : > { %1598 = shalt.err (!%p1595_p2)
}
  0x56   : > { %1387 = dma.hbm_to_vmem [thread:$0]  (!%p1823_p11), %s2206_s3, 16, %s198_s8, [#allocation11]  }
  0x57   : > { %s43_s14 = sadd.s32 1, %s1707_s17  ;;  %s34_s26 = sadd.s32 1, %s1715_s19 }
  0x58   : > { %p50_p2 = scmp.ne.s32.totalorder %s1707_s17, %s1703_s16  ;;  %p36_p8 = scmp.ge.s32.totalorder %s34_s26, 2 }
  0x59   : > { %p51_p13 = scmp.eq.s32.totalorder %s1719_s20, 0  ;;  %p2221_p6 = scmp.ne.s32.totalorder %s2214_s24, 0 }
  0x5a   : > { %p1399_p3 = scmp.lt.s32.totalorder %s1719_s20, 2  ;;  %s2236_s26 = smov (%p36_p8, %s34_s26), 0 }
  0x5b   : > { %p1909_p10 = por %p2221_p6, %p50_p2  ;;  %p52_p5 = por %p51_p13, %p50_p2 }
  0x5c   : > { %s208_s9 = sand.u32 1, %s1707_s17   ;;  %s38_s10 = ssub.s32 %s1715_s19, %s2236_s26 }
  0x5d   : > { %p41_p7 = scmp.eq.s32.totalorder %s38_s10, 0  ;;  %s1225_s8 = sshll.u32 %s208_s9, 3 }
  0x5e   : > { %s1226_s11 = sshll.u32 %s1715_s19, 7  ;;  %s212_s22 = scalar_lea.vmem [#allocation4], %s1225_s8 }
  0x5f   : > { %s1921_s12 = scalar_select %p41_p7, %s1707_s17, %s43_s14  }
  0x60   : > { %s1926_s24 = scalar_lea.hbm %s2203_s0, %s1226_s11  ;;  %s220_s28 = sshll.u32 %s212_s22, 4  ;;  %s1928_s28 = int_to_ptr.vmem [resolvable:$true] %s220_s28 }
  0x61   : > { %p1932_p11 = pnand %p1399_p3, %p52_p5  ;;  %s209_s6 = scalar_lea.sflag [#allocation5], %s208_s9 }
  0x62   : > { %s1599_s5 = scalar_lea.hbm %s1926_s24, 128  ;;  %s1604_s10 = scalar_lea.hbm %s2203_s0, 256 }
  0x63   : > { %p1600_p9 = scmp.ne.s32.totalorder %s1926_s24, %s1599_s5  ;;  %p1601_p12 = pneg %p1932_p11 }
  0x64   : > { %p1605_p4 = scmp.lt.u32.totalorder %s1926_s24, %s2203_s0  ;;  %p1606_p2 = scmp.lt.u32.totalorder %s1604_s10, %s1599_s5 }
  0x65   : > { %p1602_p0 = pnand %p1601_p12, %p1600_p9  ;;  %p1608_p13 = scmp.lt.u32.totalorder %s1599_s5, %s1926_s24 }
  0x66   : > { %p1607_p8 = por %p1606_p2, %p1605_p4 }
  0x67   : > { %p1603_p1 = pneg %p1602_p0 }
  0x68   : > { %p1609_p6 = por %p1608_p13, %p1607_p8 }
  0x6a   : > { %p1610_p3 = pnand %p1609_p6, %p1603_p1 }
  0x6c   : > { %1613 = shalt.err (!%p1610_p3)
}
  0x6d   : > { %s1614_s9 = scalar_lea.vmem %s1928_s28, 128  ;;  %s1726_s13 = smov [#allocation4]  }
  0x6e   : > { %p1615_p5 = scmp.ne.s32.totalorder %s1928_s28, %s1614_s9  ;;  %s1619_s21 = sshll.u32 %s1726_s13, 4  ;;  %s1620_s21 = int_to_ptr.vmem [resolvable:$false] %s1619_s21 }
  0x6f   : > { %s1621_s22 = scalar_lea.vmem %s1620_s21, 256  ;;  %p1622_p0 = scmp.lt.s32.totalorder %s1928_s28, %s1620_s21 }
  0x70   : > { %p1617_p7 = pnand %p1615_p5, %p1601_p12  ;;  %p1623_p4 = scmp.lt.s32.totalorder %s1621_s22, %s1614_s9 }
  0x72   : > { %p1618_p9 = pneg %p1617_p7  ;;  %p1624_p2 = por %p1623_p4, %p1622_p0 }
  0x74   : > { %p1625_p8 = pnand %p1624_p2, %p1618_p9 }
  0x76   : > { %1628 = shalt.err (!%p1625_p8)
}
  0x77   : > { %1391 = dma.hbm_to_vmem [thread:$0]  (!%p1932_p11), %s1926_s24, 128, %s1928_s28, %s209_s6  }
  0x78   : > { %p2224_p1 = scmp.ne.s32.totalorder %s2218_s27, 0 }
  0x79   : > { %s1964_s5 = sand.u32 (!%p2224_p1), 1, %s1703_s16   ;;  %p2225_p12 = scmp.ne.s32.totalorder (!%p2224_p1), %s2215_s25, 0 }
  0x7a   : > { %229 = sbr.rel (%p2224_p1) target bundleno = 6127 (0x17ef), region = 36  ;;  %s1228_s7 = sshll.u32 (!%p2224_p1), %s1964_s5, 3 }
  0x7b   : > { %s232_s14 = scalar_lea.sflag (!%p2224_p1), [#allocation5], %s1964_s5  ;;  %s235_s10 = scalar_lea.vmem (!%p2224_p1), [#allocation4], %s1228_s7 }
  0x81   : > { %1682 = dma.done.wait (%p2225_p12), %s232_s14, 128  }
  0x82   : > { %1684 = vsyncadd (%p2225_p12), %s232_s14, 4294967168  ;;  %p2226_p13 = scmp.ne.s32.totalorder %s2213_s23, 0 }
  0x84   : > { %1686 = dma.done.wait (%p2226_p13), [#allocation8], 384  }
  0x85   : > { %1688 = vsyncadd (%p2226_p13), [#allocation8], 4294966912 }
  0x86   : > { %1690 = dma.done.wait (%p2226_p13), [#allocation11], 16  }
  0x87   : > { %1692 = vsyncadd (%p2226_p13), [#allocation11], 4294967280  ;;  %vm281_vm0 = vcmask 130048   ;;  %v280_v0 = vld [vmem:[%s235_s10] sm:$0xff]  ;;  %v1982_v7 = vld [vmem:[#allocation9] sm:$0xff]   ;;  %vm277_vm1 = vcmask 253952   ;;  %v458_v47 = vlaneseq }
  0x88   : > { %v282_v1 = vsel %vm281_vm0, %v280_v0, 0.0  ;;  %v1464_v8 = vld [vmem:[#allocation7] sm:$0xff]   ;;  %v1727_v9 = vmov 0.0   ;;  %v1991_v10 = vld [vmem:[#allocation9 + $0x8] sm:$0xff]   ;;  %vm1728_vm2 = vmmov 0   ;;  %vm369_vm3 = vcmask 261120  }
  0x89   : > { %283 = vadd.xlane.f32.xlu0 %v282_v1  ;;  %1298 = vmatprep.subr.bf16.mxu1 %v1727_v9  ;;  %278 = vst.msk [vmem:[#allocation2] sm:$0x1] %vm277_vm1, %v1727_v9  ;;  %279 = vst.msk [vmem:[#allocation3] sm:$0x1] %vm277_vm1, %v1727_v9  ;;  %v348_v24 = vld [vmem:[#allocation10] sm:$0x1] }
  0x8a   : > { %1292 = vmatprep.subr.bf16.mxu0 %v1727_v9  ;;  %1299 = vmatpush3.bf16.msra.mxu1 %v1982_v7  ;;  %s1729_s23 = smov 64   ;;  %s1730_s25 = smov 32   ;;  %v459_v48 = vshrl.u32 %v458_v47, 7  ;;  %vm452_vm4 = vsmask.f32 256  ;;  %vm812_vm6 = vcmask 256002  }
  0x8b   : > { %1293 = vmatpush3.bf16.msra.mxu0 %v1464_v8  ;;  %1300 = vmatprep.subr.bf16.mxu1 %v1727_v9  ;;  %s1232_s27 = sshll.u32 %s1964_s5, 2  ;;  %vm453_vm5 = vmand %vm277_vm1, %vm452_vm4  ;;  %vm813_vm7 = vsmask.f32 2304  ;;  %vm545_vm9 = vsmask.f32 7938  ;;  %vm634_vm13 = vcmask 254977  }
  0x8c   : > { %1302 = vmatprep.mubr.msk.bf16.mxu1 %vm1728_vm2, %v1727_v9  ;;  %1294 = vmatprep.mubr.msk.bf16.mxu0 %vm1728_vm2, %v1727_v9  ;;  %v460_v49 = vsub.s32 0, %v459_v48  ;;  %s2114_s24 = scalar_lea.vmem [#allocation12], %s1232_s27  ;;  %vm814_vm8 = vmand %vm812_vm6, %vm813_vm7  ;;  %vm900_vm11 = vsmask.f32 7946  ;;  %vm635_vm14 = vsmask.f32 1280 }
  0x8d   : > { %1306 = vmatprep.subr.bf16.mxu0 %v1727_v9  ;;  %vm546_vm10 = vmand %vm277_vm1, %vm545_vm9  ;;  %vm991_vm1 = vsmask.f32 3328  ;;  %s1731_s28 = smov 96   ;;  %s1255_s29 = sshll.u32 %s1711_s18, 6 }
  0x8e   : > { %1301 = vmatpush3.bf16.msra.mxu1 %v1991_v10  ;;  %v461_v50 = vrot.slane %v348_v24, %v460_v49  ;;  %vm901_vm12 = vmand %vm812_vm6, %vm900_vm11  ;;  %vm1087_vm6 = vcmask 261127   ;;  %s1109_s6 = sshll.u32 %s2114_s24, 4  ;;  %s2152_s9 = scalar_lea.hbm %s2207_s4, %s1255_s29  ;;  %s2154_s6 = int_to_ptr.vmem [resolvable:$true] %s1109_s6 }
  0x8f   : > { %1314 = vmatprep.subr.bf16.mxu1 %v1727_v9  ;;  %vm636_vm15 = vmand %vm634_vm13, %vm635_vm14  ;;  %s1095_s18 = scalar_lea.sflag [#allocation6], %s1964_s5  ;;  %s1629_s13 = scalar_lea.vmem %s2154_s6, 64 }
  0x90   : > { %v353_v11 = vld [vmem:[#allocation2] sm:$0x1]  ;;  %v1238_v31 = vld [vmem:[#allocation3] ss:$0 sm:$0xff]  ;;  %p1630_p11 = scmp.ne.s32.totalorder %s2154_s6, %s1629_s13  ;;  %s1732_s21 = smov [#allocation12]  }
  0x91   : > { %v356_v12 = vpack.c.bf16 %v353_v11, %v353_v11  ;;  %s1633_s22 = sshll.u32 %s1732_s21, 4  ;;  %s1634_s22 = int_to_ptr.vmem [resolvable:$false] %s1633_s22 }
  0x92   : > { %p1631_p6 = pnand %p1630_p11, %p1909_p10  ;;  %s1635_s7 = scalar_lea.vmem %s1634_s22, 128 }
  0x93   : > { %1303 = vmatmul.mubr.msk.bf16.vlgmr.msra.gmra.mrb[0].mxu1 %vm369_vm3, %v356_v12  ;;  %p1636_p5 = scmp.lt.s32.totalorder %s2154_s6, %s1634_s22  ;;  %p1637_p7 = scmp.lt.s32.totalorder %s1635_s7, %s1629_s13 }
  0x94   : > { %1315 = vmatpush3.bf16.msra.mxu1 %v1982_v7  ;;  %1318 = vmatprep.mubr.msk.bf16.mxu1 %vm1728_vm2, %v1727_v9  ;;  %p1632_p3 = pneg %p1631_p6 }
  0x95   : > { %1316 = vmatprep.subr.bf16.mxu1 %v1727_v9  ;;  %p1638_p9 = por %p1637_p7, %p1636_p5 }
  0x97   : > { %p1639_p0 = pnand %p1638_p9, %p1632_p3 }
  0x98   : > { %1317 = vmatpush3.bf16.msra.mxu1 %v1991_v10 }
  0x99   : > { %1330 = vmatprep.subr.bf16.mxu1 %v1727_v9 }
 0x116   : > { %v284_v2 = vpop.xlane.xlu0 %283 }
 0x117   : > { %v286_v3 = vmul.f32 0.0625, %v284_v2 }
 0x119   : > { %v287_v4 = vsub.f32 %v280_v0, %v286_v3 }
 0x11b   : > { %v288_v5 = vmul.f32 %v287_v4, %v287_v4 }
 0x11d   : > { %v289_v6 = vsel %vm281_vm0, %v288_v5, 0.0 }
 0x11e   : > { %290 = vadd.xlane.f32.xlu0 %v289_v6 }
 0x166   : > { %v407_v19 = vpop.f32.mrb[0].mxu1 }
 0x167   : > { %v1304_v20 = vpop.f32.mrb[1].mxu1 }
 0x168   : > { %v410_v21 = vpop.f32.mrb[2].mxu1 }
 0x169   : > { %v1305_v22 = vpop.f32.mrb[3].mxu1 }
 0x1ab   : > { %v291_v13 = vpop.xlane.xlu0 %290 }
 0x1ac   : > { %v292_v14 = vmul.f32 0.0625, %v291_v13 }
 0x1ae   : > { %v293_v15 = vadd.f32 1e-05, %v292_v14 }
 0x1b0   : > { %1465 = vrsqrt.f32 %v293_v15 }
 0x1ba   : > { %v1466_v16 = vpop.eup %1465 }
 0x1bb   : > { %v295_v17 = vmul.f32 %v1466_v16, %v287_v4 }
 0x1bd   : > { %v298_v18 = vpack.c.bf16 %v295_v17, %v295_v17 }
 0x1bf   : > { %1295 = vmatmul.mubr.msk.bf16.vlgmr.msra.gmra.mrb[0].mxu0 %vm281_vm0, %v298_v18  ;;  %vm990_vm0 = vcmask 257027  }
 0x1c0   : > { %1307 = vmatpush3.bf16.msra.mxu0 %v1982_v7  ;;  %1310 = vmatprep.mubr.msk.bf16.mxu0 %vm1728_vm2, %v1727_v9 }
 0x1c1   : > { %1308 = vmatprep.subr.bf16.mxu0 %v1727_v9 }
 0x1c4   : > { %1309 = vmatpush3.bf16.msra.mxu0 %v1991_v10 }
 0x1c5   : > { %1322 = vmatprep.subr.bf16.mxu0 %v1727_v9 }
 0x292   : > { %v342_v23 = vpop.f32.mrb[0].mxu0 }
 0x293   : > { %v355_v25 = vadd.f32 %v348_v24, %v342_v23  ;;  %v1296_v26 = vpop.f32.mrb[1].mxu0  ;;  %v2030_v52 = vadd.f32 %v461_v50, %v342_v23 }
 0x294   : > { %v345_v27 = vpop.f32.mrb[2].mxu0 }
 0x295   : > { %v413_v28 = vadd.f32 %v407_v19, %v355_v25  ;;  %v1297_v29 = vpop.f32.mrb[3].mxu0 }
 0x297   : > { %1467 = vtanh.f32 %v413_v28  ;;  %v414_v32 = vmul.f32 0.5, %v413_v28 }
 0x299   : > { %1469 = vtanh.f32 %v414_v32 }
 0x2a1   : > { %v1468_v30 = vpop.eup %1467 }
 0x2a2   : > { %429 = vrot.lane.b32.xlu1 %v1468_v30, %s1729_s23 }
 0x2a3   : > { %v1470_v33 = vpop.eup %1469 }
 0x2a4   : > { %v416_v34 = vadd.f32 1.0, %v1470_v33 }
 0x2a6   : > { %424 = vrot.lane.b32.xlu1 %v1238_v31, %s1730_s25  ;;  %v417_v35 = vmul.f32 0.5, %v416_v34 }
 0x314   : > { %v430_v36 = vpop.permute.xlu1 %429 }
 0x315   : > { %v432_v37 = vmul.f32 %v430_v36, %v417_v35 }
 0x317   : > { %434 = vrot.lane.b32.xlu0 %v432_v37, %s1730_s25 }
 0x318   : > { %v425_v38 = vpop.permute.xlu1 %424 }
 0x319   : > { %v427_v39 = vmul.f32 %v425_v38, %v417_v35 }
 0x389   : > { %v435_v40 = vpop.permute.xlu0 %434 }
 0x38a   : > { %v437_v41 = vadd.f32 %v435_v40, %v427_v39 }
 0x38c   : > { %1471 = vtanh.f32 %v437_v41  ;;  %v519_v1 = vrot.slane %v437_v41, 7 }
 0x396   : > { %v1472_v42 = vpop.eup %1471 }
 0x397   : > { %440 = vrot.lane.b32.xlu1 %v1472_v42, %s1729_s23 }
 0x409   : > { %v441_v43 = vpop.permute.xlu1 %440 }
 0x40a   : > { %v443_v44 = vmul.f32 %v441_v43, %v417_v35 }
 0x40c   : > { %v2019_v45 = vpack.c.bf16 %v443_v44, %v443_v44 }
 0x40e   : > { %464 = vrot.lane.b32.xlu1 %v2019_v45, %s1730_s25 }
 0x480   : > { %v465_v46 = vpop.permute.xlu1 %464 }
 0x481   : > { %1311 = vmatmul.mubr.msk.bf16.vlgmr.msra.gmra.mrb[4].mxu0 %vm369_vm3, %v465_v46 }
 0x482   : > { %1323 = vmatpush3.bf16.msra.mxu0 %v1982_v7  ;;  %1326 = vmatprep.mubr.msk.bf16.mxu0 %vm1728_vm2, %v1727_v9 }
 0x483   : > { %1324 = vmatprep.subr.bf16.mxu0 %v1727_v9 }
 0x486   : > { %1325 = vmatpush3.bf16.msra.mxu0 %v1991_v10 }
 0x487   : > { %1338 = vmatprep.subr.bf16.mxu0 %v1727_v9 }
 0x554   : > { %v503_v51 = vpop.f32.mrb[4].mxu0 }
 0x555   : > { %v510_v53 = vrot.slane %v503_v51, 7  ;;  %v1312_v54 = vpop.f32.mrb[5].mxu0 }
 0x556   : > { %v506_v55 = vpop.f32.mrb[6].mxu0 }
 0x557   : > { %v512_v56 = vadd.f32 %v510_v53, %v2030_v52  ;;  %v1313_v57 = vpop.f32.mrb[7].mxu0 }
 0x559   : > { %1473 = vtanh.f32 %v512_v56  ;;  %v513_v59 = vmul.f32 0.5, %v512_v56 }
 0x55b   : > { %1475 = vtanh.f32 %v513_v59 }
 0x563   : > { %v1474_v58 = vpop.eup %1473 }
 0x564   : > { %523 = vrot.lane.b32.xlu1 %v1474_v58, %s1729_s23 }
 0x565   : > { %v1476_v60 = vpop.eup %1475 }
 0x566   : > { %v515_v61 = vadd.f32 1.0, %v1476_v60 }
 0x568   : > { %v516_v62 = vmul.f32 0.5, %v515_v61 }
 0x56a   : > { %v521_v2 = vmul.f32 %v519_v1, %v516_v62 }
 0x5d6   : > { %v524_v63 = vpop.permute.xlu1 %523 }
 0x5d7   : > { %v526_v0 = vmul.f32 %v524_v63, %v516_v62 }
 0x5d9   : > { %528 = vrot.lane.b32.xlu1 %v526_v0, %s1730_s25 }
 0x64b   : > { %v529_v3 = vpop.permute.xlu1 %528 }
 0x64c   : > { %v531_v4 = vadd.f32 %v529_v3, %v521_v2 }
 0x64e   : > { %1477 = vtanh.f32 %v531_v4  ;;  %v608_v27 = vrot.slane %v531_v4, 7 }
 0x658   : > { %v1478_v5 = vpop.eup %1477 }
 0x659   : > { %534 = vrot.lane.b32.xlu1 %v1478_v5, %s1729_s23 }
 0x6cb   : > { %v535_v6 = vpop.permute.xlu1 %534 }
 0x6cc   : > { %v537_v8 = vmul.f32 %v535_v6, %v516_v62 }
 0x6ce   : > { %v2036_v11 = vpack.c.bf16 %v537_v8, %v537_v8 }
 0x6d0   : > { %v551_v12 = vshrl.u32 %v2036_v11, 16 }
 0x6d2   : > { %553 = vrot.lane.b32.xlu1 %v551_v12, %s1730_s25 }
 0x744   : > { %v554_v13 = vpop.permute.xlu1 %553 }
 0x745   : > { %1319 = vmatmul.mubr.msk.bf16.vlgmr.msra.gmra.mrb[4].mxu1 %vm369_vm3, %v554_v13 }
 0x746   : > { %1331 = vmatpush3.bf16.msra.mxu1 %v1982_v7  ;;  %1334 = vmatprep.mubr.msk.bf16.mxu1 %vm1728_vm2, %v1727_v9 }
 0x747   : > { %1332 = vmatprep.subr.bf16.mxu1 %v1727_v9 }
 0x74a   : > { %1333 = vmatpush3.bf16.msra.mxu1 %v1991_v10 }
 0x74b   : > { %1346 = vmatprep.subr.bf16.mxu1 %v1727_v9 }
 0x818   : > { %v592_v14 = vpop.f32.mrb[4].mxu1 }
 0x819   : > { %v599_v15 = vrot.slane %v592_v14, 6  ;;  %v1320_v16 = vpop.f32.mrb[5].mxu1 }
 0x81a   : > { %v595_v17 = vpop.f32.mrb[6].mxu1 }
 0x81b   : > { %v601_v18 = vadd.f32 %v599_v15, %v2030_v52  ;;  %v1321_v19 = vpop.f32.mrb[7].mxu1 }
 0x81d   : > { %1479 = vtanh.f32 %v601_v18  ;;  %v602_v21 = vmul.f32 0.5, %v601_v18 }
 0x81f   : > { %1481 = vtanh.f32 %v602_v21 }
 0x827   : > { %v1480_v20 = vpop.eup %1479 }
 0x828   : > { %612 = vrot.lane.b32.xlu0 %v1480_v20, %s1729_s23 }
 0x829   : > { %v1482_v22 = vpop.eup %1481 }
 0x82a   : > { %v604_v23 = vadd.f32 1.0, %v1482_v22 }
 0x82c   : > { %v605_v24 = vmul.f32 0.5, %v604_v23 }
 0x82e   : > { %v610_v28 = vmul.f32 %v608_v27, %v605_v24 }
 0x89a   : > { %v613_v25 = vpop.permute.xlu0 %612 }
 0x89b   : > { %v615_v26 = vmul.f32 %v613_v25, %v605_v24 }
 0x89d   : > { %617 = vrot.lane.b32.xlu1 %v615_v26, %s1730_s25 }
 0x90f   : > { %v618_v29 = vpop.permute.xlu1 %617 }
 0x910   : > { %v620_v30 = vadd.f32 %v618_v29, %v610_v28 }
 0x912   : > { %1483 = vtanh.f32 %v620_v30  ;;  %v696_v51 = vrot.slane %v620_v30, 7 }
 0x91c   : > { %v1484_v31 = vpop.eup %1483 }
 0x91d   : > { %623 = vrot.lane.b32.xlu0 %v1484_v31, %s1729_s23 }
 0x98f   : > { %v624_v32 = vpop.permute.xlu0 %623 }
 0x990   : > { %v626_v33 = vmul.f32 %v624_v32, %v605_v24 }
 0x992   : > { %v2051_v34 = vpack.c.bf16 %v626_v33, %v626_v33 }
 0x994   : > { %v640_v35 = vrot.slane %v2051_v34, 1 }
 0x996   : > { %641 = vrot.lane.b32.xlu1 %v640_v35, %s1730_s25 }
 0xa08   : > { %v642_v36 = vpop.permute.xlu1 %641 }
 0xa09   : > { %1327 = vmatmul.mubr.msk.bf16.vlgmr.msra.gmra.mrb[8].mxu0 %vm369_vm3, %v642_v36 }
 0xa0a   : > { %1339 = vmatpush3.bf16.msra.mxu0 %v1982_v7  ;;  %1342 = vmatprep.mubr.msk.bf16.mxu0 %vm1728_vm2, %v1727_v9 }
 0xa0b   : > { %1340 = vmatprep.subr.bf16.mxu0 %v1727_v9 }
 0xa0e   : > { %1341 = vmatpush3.bf16.msra.mxu0 %v1991_v10 }
 0xa0f   : > { %1354 = vmatprep.subr.bf16.mxu0 %v1727_v9 }
 0xadc   : > { %v680_v37 = vpop.f32.mrb[8].mxu0 }
 0xadd   : > { %v687_v38 = vrot.slane %v680_v37, 5  ;;  %v1328_v39 = vpop.f32.mrb[9].mxu0 }
 0xade   : > { %v683_v40 = vpop.f32.mrb[10].mxu0 }
 0xadf   : > { %v689_v41 = vadd.f32 %v687_v38, %v2030_v52  ;;  %v1329_v42 = vpop.f32.mrb[11].mxu0 }
 0xae1   : > { %1485 = vtanh.f32 %v689_v41  ;;  %v690_v44 = vmul.f32 0.5, %v689_v41 }
 0xae3   : > { %1487 = vtanh.f32 %v690_v44 }
 0xaeb   : > { %v1486_v43 = vpop.eup %1485 }
 0xaec   : > { %700 = vrot.lane.b32.xlu0 %v1486_v43, %s1729_s23 }
 0xaed   : > { %v1488_v46 = vpop.eup %1487 }
 0xaee   : > { %v692_v47 = vadd.f32 1.0, %v1488_v46 }
 0xaf0   : > { %v693_v48 = vmul.f32 0.5, %v692_v47 }
 0xaf2   : > { %v698_v53 = vmul.f32 %v696_v51, %v693_v48 }
 0xb5e   : > { %v701_v49 = vpop.permute.xlu0 %700 }
 0xb5f   : > { %v703_v50 = vmul.f32 %v701_v49, %v693_v48 }
 0xb61   : > { %705 = vrot.lane.b32.xlu1 %v703_v50, %s1730_s25 }
 0xbd3   : > { %v706_v54 = vpop.permute.xlu1 %705 }
 0xbd4   : > { %v708_v55 = vadd.f32 %v706_v54, %v698_v53 }
 0xbd6   : > { %1489 = vtanh.f32 %v708_v55  ;;  %v786_v16 = vrot.slane %v708_v55, 7 }
 0xbe0   : > { %v1490_v56 = vpop.eup %1489 }
 0xbe1   : > { %711 = vrot.lane.b32.xlu0 %v1490_v56, %s1729_s23 }
 0xc53   : > { %v712_v57 = vpop.permute.xlu0 %711 }
 0xc54   : > { %v714_v58 = vmul.f32 %v712_v57, %v693_v48 }
 0xc56   : > { %v2066_v59 = vpack.c.bf16 %v714_v58, %v714_v58 }
 0xc58   : > { %v728_v60 = vshrl.u32 %v2066_v59, 16 }
 0xc5a   : > { %v730_v61 = vrot.slane %v728_v60, 1 }
 0xc5c   : > { %731 = vrot.lane.b32.xlu1 %v730_v61, %s1730_s25 }
 0xcce   : > { %v732_v62 = vpop.permute.xlu1 %731 }
 0xccf   : > { %1335 = vmatmul.mubr.msk.bf16.vlgmr.msra.gmra.mrb[8].mxu1 %vm369_vm3, %v732_v62 }
 0xcd0   : > { %1347 = vmatpush3.bf16.msra.mxu1 %v1982_v7  ;;  %1350 = vmatprep.mubr.msk.bf16.mxu1 %vm1728_vm2, %v1727_v9 }
 0xcd1   : > { %1348 = vmatprep.subr.bf16.mxu1 %v1727_v9 }
 0xcd4   : > { %1349 = vmatpush3.bf16.msra.mxu1 %v1991_v10 }
 0xda2   : > { %v770_v63 = vpop.f32.mrb[8].mxu1 }
 0xda3   : > { %v777_v0 = vrot.slane %v770_v63, 4  ;;  %v1336_v1 = vpop.f32.mrb[9].mxu1 }
 0xda4   : > { %v773_v2 = vpop.f32.mrb[10].mxu1 }
 0xda5   : > { %v779_v3 = vadd.f32 %v777_v0, %v2030_v52  ;;  %v1337_v4 = vpop.f32.mrb[11].mxu1 }
 0xda7   : > { %1491 = vtanh.f32 %v779_v3  ;;  %v780_v6 = vmul.f32 0.5, %v779_v3 }
 0xda9   : > { %1493 = vtanh.f32 %v780_v6 }
 0xdb1   : > { %v1492_v5 = vpop.eup %1491 }
 0xdb2   : > { %790 = vrot.lane.b32.xlu0 %v1492_v5, %s1729_s23 }
 0xdb3   : > { %v1494_v8 = vpop.eup %1493 }
 0xdb4   : > { %v782_v12 = vadd.f32 1.0, %v1494_v8 }
 0xdb6   : > { %v783_v13 = vmul.f32 0.5, %v782_v12 }
 0xdb8   : > { %v788_v17 = vmul.f32 %v786_v16, %v783_v13 }
 0xe24   : > { %v791_v14 = vpop.permute.xlu0 %790 }
 0xe25   : > { %v793_v15 = vmul.f32 %v791_v14, %v783_v13 }
 0xe27   : > { %795 = vrot.lane.b32.xlu1 %v793_v15, %s1730_s25 }
 0xe99   : > { %v796_v18 = vpop.permute.xlu1 %795 }
 0xe9a   : > { %v798_v19 = vadd.f32 %v796_v18, %v788_v17 }
 0xe9c   : > { %1495 = vtanh.f32 %v798_v19 }
 0xea6   : > { %v1496_v20 = vpop.eup %1495 }
 0xea7   : > { %801 = vrot.lane.b32.xlu0 %v1496_v20, %s1729_s23 }
 0xf19   : > { %v802_v21 = vpop.permute.xlu0 %801 }
 0xf1a   : > { %v804_v22 = vmul.f32 %v802_v21, %v783_v13 }
 0xf1c   : > { %v2080_v23 = vpack.c.bf16 %v804_v22, %v804_v22 }
 0xf1e   : > { %v818_v24 = vrot.slane %v2080_v23, 2 }
 0xf20   : > { %819 = vrot.lane.b32.xlu1 %v818_v24, %s1730_s25 }
 0xf92   : > { %v820_v25 = vpop.permute.xlu1 %819 }
 0xf93   : > { %1343 = vmatmul.mubr.msk.bf16.vlgmr.msra.gmra.mrb[12].mxu0 %vm369_vm3, %v820_v25 }
 0xf94   : > { %1355 = vmatpush3.bf16.msra.mxu0 %v1982_v7  ;;  %1358 = vmatprep.mubr.msk.bf16.mxu0 %vm1728_vm2, %v1727_v9  ;;  %vm992_vm2 = vmand %vm990_vm0, %vm991_vm1 }
 0xf95   : > { %1356 = vmatprep.subr.bf16.mxu0 %v1727_v9 }
 0xf98   : > { %1357 = vmatpush3.bf16.msra.mxu0 %v1991_v10  ;;  %v874_v10 = vrot.slane %v798_v19, 7 }
0x1066   : > { %v858_v26 = vpop.f32.mrb[12].mxu0 }
0x1067   : > { %v865_v27 = vrot.slane %v858_v26, 3  ;;  %v1344_v28 = vpop.f32.mrb[13].mxu0 }
0x1068   : > { %v861_v29 = vpop.f32.mrb[14].mxu0 }
0x1069   : > { %v867_v30 = vadd.f32 %v865_v27, %v2030_v52  ;;  %v1345_v31 = vpop.f32.mrb[15].mxu0 }
0x106a   : > { %v815_v31 = vld [vmem:[%s2114_s24] sm:$0x4] }
0x106b   : > { %1497 = vtanh.f32 %v867_v30  ;;  %v868_v33 = vmul.f32 0.5, %v867_v30 }
0x106d   : > { %1499 = vtanh.f32 %v868_v33 }
0x1075   : > { %v1498_v32 = vpop.eup %1497 }
0x1076   : > { %878 = vrot.lane.b32.xlu0 %v1498_v32, %s1729_s23 }
0x1077   : > { %v1500_v7 = vpop.eup %1499 }
0x1078   : > { %v870_v35 = vadd.f32 1.0, %v1500_v7 }
0x107a   : > { %v871_v36 = vmul.f32 0.5, %v870_v35 }
0x107c   : > { %v876_v38 = vmul.f32 %v874_v10, %v871_v36 }
0x10e8   : > { %v879_v37 = vpop.permute.xlu0 %878 }
0x10e9   : > { %v881_v9 = vmul.f32 %v879_v37, %v871_v36 }
0x10eb   : > { %883 = vrot.lane.b32.xlu1 %v881_v9, %s1730_s25 }
0x115d   : > { %v884_v39 = vpop.permute.xlu1 %883 }
0x115e   : > { %v886_v40 = vadd.f32 %v884_v39, %v876_v38 }
0x1160   : > { %1501 = vtanh.f32 %v886_v40  ;;  %v964_v0 = vrot.slane %v886_v40, 7 }
0x116a   : > { %v1502_v41 = vpop.eup %1501 }
0x116b   : > { %889 = vrot.lane.b32.xlu0 %v1502_v41, %s1729_s23  ;;  %v637_v41 = vld [vmem:[%s2114_s24] sm:$0x2] }
0x11dd   : > { %v890_v42 = vpop.permute.xlu0 %889 }
0x11de   : > { %v892_v43 = vmul.f32 %v890_v42, %v871_v36 }
0x11e0   : > { %v893_v44 = vpack.c.bf16 %v892_v43, %v892_v43 }
0x11e2   : > { %v906_v46 = vshrl.u32 %v893_v44, 16 }
0x11e4   : > { %v908_v47 = vrot.slane %v906_v46, 2 }
0x11e6   : > { %909 = vrot.lane.b32.xlu1 %v908_v47, %s1730_s25 }
0x1258   : > { %v910_v48 = vpop.permute.xlu1 %909 }
0x1259   : > { %1351 = vmatmul.mubr.msk.bf16.vlgmr.msra.gmra.mrb[12].mxu1 %vm369_vm3, %v910_v48 }
0x132c   : > { %v948_v49 = vpop.f32.mrb[12].mxu1 }
0x132d   : > { %v955_v50 = vrot.slane %v948_v49, 2  ;;  %v1352_v51 = vpop.f32.mrb[13].mxu1 }
0x132e   : > { %v951_v53 = vpop.f32.mrb[14].mxu1 }
0x132f   : > { %v957_v54 = vadd.f32 %v955_v50, %v2030_v52  ;;  %v1353_v55 = vpop.f32.mrb[15].mxu1 }
0x1331   : > { %1503 = vtanh.f32 %v957_v54  ;;  %v958_v57 = vmul.f32 0.5, %v957_v54 }
0x1333   : > { %1505 = vtanh.f32 %v958_v57 }
0x133b   : > { %v1504_v56 = vpop.eup %1503 }
0x133c   : > { %968 = vrot.lane.b32.xlu0 %v1504_v56, %s1729_s23 }
0x133d   : > { %v1506_v58 = vpop.eup %1505 }
0x133e   : > { %v960_v60 = vadd.f32 1.0, %v1506_v58 }
0x1340   : > { %v961_v61 = vmul.f32 0.5, %v960_v60 }
0x1342   : > { %v966_v1 = vmul.f32 %v964_v0, %v961_v61 }
0x13ae   : > { %v969_v62 = vpop.permute.xlu0 %968 }
0x13af   : > { %v971_v63 = vmul.f32 %v969_v62, %v961_v61 }
0x13b1   : > { %973 = vrot.lane.b32.xlu1 %v971_v63, %s1730_s25 }
0x1423   : > { %v974_v2 = vpop.permute.xlu1 %973 }
0x1424   : > { %v976_v3 = vadd.f32 %v974_v2, %v966_v1 }
0x1426   : > { %1507 = vtanh.f32 %v976_v3 }
0x1430   : > { %v1508_v4 = vpop.eup %1507 }
0x1431   : > { %979 = vrot.lane.b32.xlu0 %v1508_v4, %s1729_s23 }
0x14a3   : > { %v980_v5 = vpop.permute.xlu0 %979 }
0x14a4   : > { %v982_v6 = vmul.f32 %v980_v5, %v961_v61 }
0x14a6   : > { %v983_v8 = vpack.c.bf16 %v982_v6, %v982_v6 }
0x14a8   : > { %v996_v12 = vrot.slane %v983_v8, 3 }
0x14aa   : > { %997 = vrot.lane.b32.xlu1 %v996_v12, %s1730_s25 }
0x151c   : > { %v998_v13 = vpop.permute.xlu1 %997 }
0x151d   : > { %1359 = vmatmul.mubr.msk.bf16.vlgmr.msra.gmra.mrb[16].mxu0 %vm369_vm3, %v998_v13  ;;  %vm722_vm3 = vsmask.f32 7942 }
0x151e   : > { %vm723_vm4 = vmand %vm634_vm13, %vm722_vm3 }
0x15f0   : > { %v1036_v14 = vpop.f32.mrb[16].mxu0 }
0x15f1   : > { %v1043_v15 = vrot.slane %v1036_v14, 1  ;;  %v1360_v16 = vpop.f32.mrb[17].mxu0 }
0x15f2   : > { %v1039_v17 = vpop.f32.mrb[18].mxu0 }
0x15f3   : > { %v1045_v18 = vadd.f32 %v1043_v15, %v2030_v52  ;;  %v1361_v19 = vpop.f32.mrb[19].mxu0  ;;  %v1052_v52 = vrot.slane %v976_v3, 7 }
0x15f5   : > { %1509 = vtanh.f32 %v1045_v18  ;;  %v1046_v21 = vmul.f32 0.5, %v1045_v18 }
0x15f7   : > { %1511 = vtanh.f32 %v1046_v21 }
0x15ff   : > { %v1510_v20 = vpop.eup %1509 }
0x1600   : > { %1056 = vrot.lane.b32.xlu0 %v1510_v20, %s1729_s23 }
0x1601   : > { %v1512_v22 = vpop.eup %1511 }
0x1602   : > { %v1048_v24 = vadd.f32 1.0, %v1512_v22 }
0x1604   : > { %v1049_v25 = vmul.f32 0.5, %v1048_v24 }
0x1606   : > { %v1054_v28 = vmul.f32 %v1052_v52, %v1049_v25 }
0x1672   : > { %v1057_v26 = vpop.permute.xlu0 %1056 }
0x1673   : > { %v1059_v27 = vmul.f32 %v1057_v26, %v1049_v25 }
0x1675   : > { %1061 = vrot.lane.b32.xlu1 %v1059_v27, %s1730_s25 }
0x1679   : > { %448 = vrot.lane.b32.xlu1 %v2019_v45, %s1730_s25  ;;  %v454_v45 = vld [vmem:[%s2114_s24] sm:$0x1] }
0x167d   : > { %809 = vrot.lane.b32.xlu1 %v2080_v23, %s1730_s25 }
0x1681   : > { %542 = vrot.lane.b32.xlu1 %v2036_v11, %s1730_s25 }
0x1685   : > { %897 = vrot.lane.b32.xlu1 %v893_v44, %s1730_s25 }
0x16e7   : > { %v1062_v29 = vpop.permute.xlu1 %1061 }
0x16e8   : > { %v1064_v30 = vadd.f32 %v1062_v29, %v1054_v28 }
0x16ea   : > { %1513 = vtanh.f32 %v1064_v30 }
0x16eb   : > { %v449_v11 = vpop.permute.xlu1 %448 }
0x16ec   : > { %v455_v23 = vsel %vm453_vm5, %v449_v11, %v454_v45  ;;  %vm1078_vm5 = vsmask.f32 7950 }
0x16ed   : > { %456 = vst [vmem:[%s2114_s24] sm:$0x1] %v455_v23  ;;  %vm1079_vm7 = vmand %vm990_vm0, %vm1078_vm5 }
0x16ef   : > { %v810_v32 = vpop.permute.xlu1 %809 }
0x16f0   : > { %v816_v33 = vsel %vm814_vm8, %v810_v32, %v815_v31 }
0x16f1   : > { %817 = vst [vmem:[%s2114_s24] sm:$0x4] %v816_v33 }
0x16f3   : > { %v543_v7 = vpop.permute.xlu1 %542 }
0x16f4   : > { %v1514_v35 = vpop.eup %1513  ;;  %v547_v36 = vld [vmem:[%s2114_s24] sm:$0x1] }
0x16f5   : > { %v548_v37 = vsel %vm546_vm10, %v543_v7, %v547_v36  ;;  %1067 = vrot.lane.b32.xlu0 %v1514_v35, %s1729_s23 }
0x16f6   : > { %549 = vst [vmem:[%s2114_s24] sm:$0x1] %v548_v37 }
0x16f7   : > { %v898_v9 = vpop.permute.xlu1 %897 }
0x16f8   : > { %v902_v10 = vld [vmem:[%s2114_s24] sm:$0x4] }
0x16f9   : > { %v903_v38 = vsel %vm901_vm12, %v898_v9, %v902_v10  ;;  %631 = vrot.lane.b32.xlu0 %v2051_v34, %s1730_s25 }
0x16fa   : > { %904 = vst [vmem:[%s2114_s24] sm:$0x4] %v903_v38 }
0x16fd   : > { %987 = vrot.lane.b32.xlu0 %v983_v8, %s1730_s25 }
0x1701   : > { %719 = vrot.lane.b32.xlu0 %v2066_v59, %s1730_s25  ;;  %v993_v59 = vld [vmem:[%s2114_s24] sm:$0x8] }
0x1767   : > { %v1068_v39 = vpop.permute.xlu0 %1067 }
0x1768   : > { %v1070_v40 = vmul.f32 %v1068_v39, %v1049_v25 }
0x176a   : > { %v1265_v42 = vpack.c.bf16 %v1070_v40, %v1070_v40  ;;  %1084 = vrot.lane.b32.xlu1 %v1070_v40, %s1730_s25 }
0x176b   : > { %v632_v34 = vpop.permute.xlu0 %631 }
0x176c   : > { %v638_v43 = vsel %vm636_vm15, %v632_v34, %v637_v41  ;;  %1075 = vrot.lane.b32.xlu0 %v1265_v42, %s1730_s25 }
0x176d   : > { %639 = vst [vmem:[%s2114_s24] sm:$0x2] %v638_v43 }
0x176f   : > { %v988_v44 = vpop.permute.xlu0 %987 }
0x1770   : > { %v994_v46 = vsel %vm992_vm2, %v988_v44, %v993_v59  ;;  %1090 = vrot.lane.b32.xlu0 %v1064_v30, %s1731_s28 }
0x1771   : > { %995 = vst [vmem:[%s2114_s24] sm:$0x8] %v994_v46 }
0x1773   : > { %v720_v47 = vpop.permute.xlu0 %719 }
0x1774   : > { %v724_v48 = vld [vmem:[%s2114_s24] sm:$0x2] }
0x1775   : > { %v725_v49 = vsel %vm723_vm4, %v720_v47, %v724_v48 }
0x1776   : > { %726 = vst [vmem:[%s2114_s24] sm:$0x2] %v725_v49 }
0x1778   : > { %v1080_v51 = vld [vmem:[%s2114_s24] sm:$0x8] }
0x17dc   : > { %v1085_v50 = vpop.permute.xlu1 %1084 }
0x17dd   : > { %1088 = vst.msk [vmem:[#allocation2 - $0x7] sm:$0x80] %vm1087_vm6, %v1085_v50 }
0x17de   : > { %v1076_v53 = vpop.permute.xlu0 %1075 }
0x17df   : > { %v1081_v54 = vsel %vm1079_vm7, %v1076_v53, %v1080_v51 }
0x17e0   : > { %1082 = vst [vmem:[%s2114_s24] sm:$0x8] %v1081_v54 }
0x17e1   : > { %1642 = shalt.err (!%p1639_p0)
}
0x17e2   : > { %s1643_s5 = scalar_lea.hbm %s2152_s9, 64  ;;  %s1647_s23 = scalar_lea.hbm %s2207_s4, 128 }
0x17e3   : > { %p1644_p4 = scmp.ne.s32.totalorder %s2152_s9, %s1643_s5  ;;  %p1648_p1 = scmp.lt.u32.totalorder %s2152_s9, %s2207_s4 }
0x17e4   : > { %p1649_p12 = scmp.lt.u32.totalorder %s1647_s23, %s1643_s5  ;;  %p1651_p11 = scmp.lt.u32.totalorder %s1643_s5, %s2152_s9 }
0x17e5   : > { %p1645_p2 = pnand %p1644_p4, %p1909_p10 }
0x17e6   : > { %p1650_p13 = por %p1649_p12, %p1648_p1 }
0x17e7   : > { %p1646_p8 = pneg %p1645_p2 }
0x17e8   : > { %p1652_p6 = por %p1651_p11, %p1650_p13 }
0x17ea   : > { %p1653_p3 = pnand %p1652_p6, %p1646_p8 }
0x17ec   : > { %1656 = shalt.err (!%p1653_p3)
}
0x17ed   : > { %1376 = dma.vmem_to_hbm [thread:$0]  (%p1909_p10), %s2154_s6, 64, %s2152_s9, %s1095_s18   ;;  %v1091_v55 = vpop.permute.xlu0 %1090 }
0x17ee   : > { %1093 = vst.msk [vmem:[#allocation3 - $0x7] sm:$0x80] %vm1087_vm6, %v1091_v55 }
0x17ef PF: > { %s2227_s24 = sld [smem:[#allocation17_spill]]  ;;  %s1121_s28 = sand.u32 1, %s1699_s15  }
0x17f0   : > { %p2229_p7 = scmp.ge.s32.totalorder %s1719_s20, 2  ;;  %s1122_s29 = scalar_lea.sflag [#allocation6], %s1121_s28 }
0x17f5   : > { %p2228_p5 = scmp.ne.s32.totalorder %s2227_s24, 0 }
0x17f7   : > { %p1393_p9 = pnand %p2229_p7, %p2228_p5 }
0x17f9   : > { %1694 = dma.done.wait (!%p1393_p9), %s1122_s29, 64  }
0x17fa   : > { %1696 = vsyncadd (!%p1393_p9), %s1122_s29, 4294967232  ;;  %s22_s20 = sadd.s32 1, %s1719_s20   ;;  %s2230_s15 = smov %s1703_s16 }
0x17fb   : > { %p19_p0 = scmp.ge.s32.totalorder %s22_s20, 4   ;;  %s2231_s16 = smov %s1707_s17 }
0x17fc   : > { %s2232_s17 = smov %s1921_s12  ;;  %s2233_s18 = smov %s1715_s19 }
0x17fd   : > { %s2234_s19 = smov %s2236_s26  ;;  %21 = sbr.rel (!%p19_p0) target bundleno = 8 (0x8), region = 97 }
0x1804   :  { %1127 = vsyncpa [#allocation5], 1 }
0x1805   :  { %1129 = vsyncpa [#allocation5 + $0x1], 1 }
0x1806   :  { %1130 = vsyncpa [#allocation8], 1 }
0x1807   :  { %1131 = vsyncpa [#allocation11], 1 }
0x1808   :  { %1132 = vsyncpa [#allocation6], 1 }
0x1809   :  { %1134 = vsyncpa [#allocation6 + $0x1], 1 }

</bundles_post_ra>
